<compile_context>
chip_gen: v7x
topology: tpu7x:2x2x1
jax: 0.10.0
libtpu: 0.0.40
codegen_flags: <defaults>
</compile_context>

<pallas_src>
import jax
import jax.numpy as jnp
from jax import lax
from jax.experimental import pallas as pl
from jax.experimental.pallas import tpu as pltpu

LANE = 128      # TPU lane width
SUBLANE = 8     # f32 sublane width


def _round_up(x, m):
    return ((x + m - 1) // m) * m


# ----------------------------------------------------------------------------- kernel
def _make_gnn_kernel(num_h_layers: int, num_row_tiles: int, num_k_tiles: int,
                     tile_n: int, num_mid: int):
    """Fused GCN + mean-pool + classifier kernel.

    Grid = (L, I, K):
      L = gnn_layers - 1  h-producing layers (the last GCNConv is folded into the tail)
      I = row tiles of the padded node dimension
      K = contraction tiles over A_hat's columns (reduction axis, last)

    Ref order (num_mid > 0):
      a, xw0, b0, w_mid, b_mid, pa, w_fold, b_fold, out, acc, h_pp, g_acc
    (w_mid / b_mid are dropped when num_mid == 0)
    """
    L, I, K = num_h_layers, num_row_tiles, num_k_tiles

    def kernel(*refs):
        if num_mid > 0:
            (a_ref, xw0_ref, b0_ref, w_mid_ref, b_mid_ref, pa_ref,
             w_fold_ref, b_fold_ref, out_ref, acc_ref, h_ref, g_ref) = refs
        else:
            (a_ref, xw0_ref, b0_ref, pa_ref,
             w_fold_ref, b_fold_ref, out_ref, acc_ref, h_ref, g_ref) = refs
            w_mid_ref = b_mid_ref = None

        f32, bf16 = jnp.float32, jnp.bfloat16
        l = pl.program_id(0)
        i = pl.program_id(1)
        k = pl.program_id(2)

        # ---------------- init ----------------
        @pl.when((l == 0) & (i == 0) & (k == 0))
        def _():
            g_ref[...] = jnp.zeros_like(g_ref)

        @pl.when(k == 0)
        def _():
            acc_ref[...] = jnp.zeros_like(acc_ref)

        a_tile = a_ref[...]                                        # (tm, tk) bf16
        k_start = pl.multiple_of(k * tile_n, tile_n)

        # ---------------- contraction: acc += A[i, k] @ h_prev[k] ----------------
        @pl.when(l == 0)
        def _():
            # layer 0: h_prev = x @ W0 (hoisted to host, lane-dense bf16, VMEM resident)
            acc_ref[...] += jnp.dot(a_tile, xw0_ref[pl.ds(k_start, tile_n), :],
                                    preferred_element_type=f32)

        if num_mid > 0:
            @pl.when(l > 0)
            def _():
                # middle layers: previous layer's h from the ping-pong VMEM scratch
                src = lax.rem(l + 1, 2)
                h_prev = h_ref[src, pl.ds(k_start, tile_n), :].astype(bf16)
                acc_ref[...] += jnp.dot(a_tile, h_prev, preferred_element_type=f32)

        # ---------------- epilogue at the last contraction tile ----------------
        @pl.when(k == K - 1)
        def _():
            row = pl.multiple_of(i * tile_n, tile_n)

            @pl.when(l == 0)
            def _():                                   # relu(A @ (x W0) + b0)
                h_ref[0, pl.ds(row, tile_n), :] = jnp.maximum(
                    acc_ref[...] + b0_ref[...], 0.0)

            if num_mid > 0:
                @pl.when(l > 0)
                def _():                               # relu((A @ h) @ W_l + b_l)
                    dst = lax.rem(l, 2)
                    lidx = jnp.maximum(l - 1, 0)
                    hw = jnp.dot(acc_ref[...].astype(bf16), w_mid_ref[lidx],
                                 preferred_element_type=f32)
                    h_ref[dst, pl.ds(row, tile_n), :] = jnp.maximum(
                        hw + b_mid_ref[lidx], 0.0)

            # Fused tail: last GCN layer + mean pool + classifier.
            #   y = pool @ (A @ (h @ W_L) + b_L) @ w_cls.T + b_cls
            #     = (PA @ h) @ W_fold + b_fold          (PA = pool @ A, folded on host)
            @pl.when(l == L - 1)
            def _():
                h_tile = h_ref[(L - 1) % 2, pl.ds(row, tile_n), :].astype(bf16)
                g_ref[...] += jnp.dot(pa_ref[:, pl.ds(row, tile_n)], h_tile,
                                      preferred_element_type=f32)

            @pl.when((l == L - 1) & (i == I - 1))
            def _():
                # Tiny (G, Hp) -> (G, 1) classifier kept in f32 (VPU/XLU), no extra
                # bf16 roundings.  TODO(synk): present a lane-dense output if G grows large.
                out_ref[...] = (jnp.sum(g_ref[...] * w_fold_ref[...],
                                        axis=-1, keepdims=True) + b_fold_ref[...])

    return kernel


# ----------------------------------------------------------------------------- host prep
def prepare_inputs(a_hat, x, gnn_weights, gnn_biases, pool_mat, w_cls, b_cls):
    """Hoist x@W0, fold pool@A_hat and last-layer/classifier, pad to lane multiples."""
    num_layers = len(gnn_weights)
    assert num_layers >= 2, "fused kernel expects gnn_layers >= 2"
    f32, bf16 = jnp.float32, jnp.bfloat16

    hidden = gnn_weights[0].shape[1]
    hp = _round_up(hidden, LANE)                 # lane multiple (not max(128, hidden))
    n = a_hat.shape[0]
    g = pool_mat.shape[0]

    n_pad = _round_up(n, LANE)
    # 512-multiples amortize the per-grid-step overhead and are multiples of the
    # v5e (128) and v6e/v7x (256) MXU widths; fall back until it divides n_pad.
    tile_n = next(t for t in (512, 256, 128) if n_pad % t == 0)
    g_pad = _round_up(g, SUBLANE)

    def pad2(m, rows, cols):
        return jnp.pad(m, ((0, rows - m.shape[0]), (0, cols - m.shape[1])))

    a_p = pad2(a_hat.astype(f32), n_pad, n_pad).astype(bf16)              # (Np, Np)

    # layer-0 feature projection hoisted to the host (lane-dense)
    xw0 = pad2(x.astype(f32) @ gnn_weights[0].astype(f32), n_pad, hp).astype(bf16)
    b0 = pad2(gnn_biases[0].astype(f32), 1, hp)                           # (1, Hp) f32

    num_mid = num_layers - 2
    if num_mid > 0:
        w_mid = jnp.stack([pad2(w.astype(f32), hp, hp)
                           for w in gnn_weights[1:-1]]).astype(bf16)      # (Lm, Hp, Hp)
        b_mid = jnp.stack([pad2(b.astype(f32), 1, hp)
                           for b in gnn_biases[1:-1]])                    # (Lm, 1, Hp) f32
    else:
        w_mid = b_mid = None

    # pool folded through the last adjacency: PA = pool @ A_hat
    pa = pad2(pool_mat.astype(f32) @ a_hat.astype(f32), g_pad, n_pad).astype(bf16)

    # last GCN layer + classifier folded (exact: no ReLU/dropout after the last layer)
    w_fold = pad2((gnn_weights[-1].astype(f32) @ w_cls.astype(f32).T).T, 1, hp)   # (1, Hp) f32
    b_fold = gnn_biases[-1].astype(f32) @ w_cls.astype(f32).T + b_cls.astype(f32)  # (1, 1)

    return dict(a=a_p, xw0=xw0, b0=b0, w_mid=w_mid, b_mid=b_mid,
                pa=pa, w_fold=w_fold, b_fold=b_fold,
                num_mid=num_mid, n=n, n_pad=n_pad, g=g, g_pad=g_pad,
                hp=hp, tile_n=tile_n)


def gnn_wrapper_forward(a_hat, x, gnn_weights, gnn_biases, pool_mat, w_cls, b_cls):
    prep = prepare_inputs(a_hat, x, gnn_weights, gnn_biases, pool_mat, w_cls, b_cls)
    return fused_pallas_forward(prep)


def fused_pallas_forward(prep):
    f32 = jnp.float32
    num_mid = prep["num_mid"]
    n_pad, g_pad, hp, tile = prep["n_pad"], prep["g_pad"], prep["hp"], prep["tile_n"]
    L = num_mid + 1                       # h-producing layers
    I = n_pad // tile
    K = n_pad // tile
    nbuf = 2 if L > 1 else 1

    inputs = [prep["a"], prep["xw0"], prep["b0"]]
    if num_mid > 0:
        inputs += [prep["w_mid"], prep["b_mid"]]
    inputs += [prep["pa"], prep["w_fold"], prep["b_fold"]]

    vmem_full = pl.BlockSpec(memory_space=pltpu.MemorySpace.VMEM)
    a_spec = pl.BlockSpec((tile, tile), lambda l, i, k: (i, k))   # streamed from HBM
    in_specs = [a_spec] + [vmem_full] * (len(inputs) - 1)
    out_spec = pl.BlockSpec((g_pad, 1), lambda l, i, k: (0, 0))

    scratch = [pltpu.VMEM((tile, hp), f32),          # acc (row tile accumulator)
               pltpu.VMEM((nbuf, n_pad, hp), f32),   # h ping-pong (persists across layers)
               pltpu.VMEM((g_pad, hp), f32)]         # pooled-graph accumulator

    # explicit VMEM budget (default scoped limit is only 16/32 MiB)
    resident = (2 * tile * tile * 2                        # A tile, double-buffered, bf16
                + prep["xw0"].size * 2 + prep["pa"].size * 2
                + (prep["w_mid"].size * 2 + prep["b_mid"].size * 4 if num_mid > 0 else 0)
                + prep["b0"].size * 4 + prep["w_fold"].size * 4 + prep["b_fold"].size * 4
                + tile * hp * 4 + nbuf * n_pad * hp * 4 + g_pad * hp * 4 + g_pad * 4)
    vmem_limit = int(min(max(resident * 1.25, 16 * 2**20), 96 * 2**20))

    flops = (L * 2 * n_pad * n_pad * hp            # A @ h per layer
             + num_mid * 2 * n_pad * hp * hp       # (A h) @ W per middle layer
             + 2 * g_pad * n_pad * hp              # PA @ h tail
             + 2 * g_pad * hp)                     # classifier
    bytes_accessed = (L * n_pad * n_pad * 2        # A streamed once per layer
                      + sum(int(a.size) * a.dtype.itemsize for a in inputs[1:])
                      + g_pad * 4)

    kernel = _make_gnn_kernel(L, I, K, tile, num_mid)
    out = pl.pallas_call(
        kernel,
        out_shape=jax.ShapeDtypeStruct((g_pad, 1), f32),
        grid_spec=pltpu.PrefetchScalarGridSpec(
            num_scalar_prefetch=0,
            grid=(L, I, K),
            in_specs=in_specs,
            out_specs=out_spec,
            scratch_shapes=scratch),
        compiler_params=pltpu.CompilerParams(
            # All axes carry scratch dependencies (acc over K, h ping-pong over L/I,
            # g_acc over I) so none can be megacore-'parallel' in this fused form.
            # TODO(synk): per-layer pallas_calls would allow a 'parallel' row axis (v7x 2 TCs).
            dimension_semantics=("arbitrary", "arbitrary", "arbitrary"),
            vmem_limit_bytes=vmem_limit),
        cost_estimate=pl.CostEstimate(flops=flops, transcendentals=0,
                                      bytes_accessed=bytes_accessed),
    )(*inputs)
    return out[:prep["g"], :]


# ----------------------------------------------------------------------------- references
def fused_reference(prep):
    """Pure-JAX mirror of the kernel math (same folds / padding / bf16 casts / op order)."""
    f32, bf16 = jnp.float32, jnp.bfloat16
    a = prep["a"]
    h = jnp.maximum(jnp.dot(a, prep["xw0"], preferred_element_type=f32) + prep["b0"], 0.0)
    for l in range(prep["num_mid"]):
        ah = jnp.dot(a, h.astype(bf16), preferred_element_type=f32)
        h = jnp.maximum(jnp.dot(ah.astype(bf16), prep["w_mid"][l],
                                preferred_element_type=f32) + prep["b_mid"][l], 0.0)
    g = jnp.dot(prep["pa"], h.astype(bf16), preferred_element_type=f32)
    y = jnp.sum(g * prep["w_fold"], axis=-1, keepdims=True) + prep["b_fold"]
    return y[:prep["g"], :]


def reference_forward_f32(a_hat, x, gnn_weights, gnn_biases, pool_mat, w_cls, b_cls):
    """Unfused, unpadded full-f32 reference of the original module math."""
    h = x.astype(jnp.float32)
    n = len(gnn_weights)
    for l, (w, b) in enumerate(zip(gnn_weights, gnn_biases)):
        h = a_hat @ (h @ w) + b
        if l < n - 1:
            h = jnp.maximum(h, 0.0)
    g = pool_mat @ h
    return g @ w_cls.T + b_cls


# ----------------------------------------------------------------------------- glue
def build_normalized_adjacency(edge_index, num_nodes):
    """A_hat = D^{-1/2} (A + I_remaining) D^{-1/2} (matching PyG gcn_norm)."""
    src, dst = edge_index[0], edge_index[1]
    a = jnp.zeros((num_nodes, num_nodes), jnp.float32)
    a = a.at[dst, src].add(1.0)
    diag = jnp.diagonal(a)
    a = a + jnp.diag(jnp.where(diag == 0, 1.0, 0.0))
    deg = a.sum(axis=1)
    dinv = jnp.where(deg > 0, 1.0 / jnp.sqrt(deg), 0.0)
    return dinv[:, None] * a * dinv[None, :]


def build_mean_pool_matrix(batch, num_graphs, num_nodes):
    """P[g, n] = 1/|V_g| if batch[n] == g else 0  -> mean pool as a matmul."""
    onehot = (batch[None, :] == jnp.arange(num_graphs)[:, None]).astype(jnp.float32)
    counts = jnp.maximum(onehot.sum(axis=1, keepdims=True), 1.0)
    return onehot / counts


def init_params(key, in_channels, hidden_channels, gnn_layers):
    keys = jax.random.split(key, 2 * gnn_layers + 2)
    gnn_w, gnn_b = [], []
    c_in = in_channels
    for l in range(gnn_layers):
        w = 0.1 * jax.random.normal(keys[2 * l], (c_in, hidden_channels), jnp.float32)
        b = 0.05 * jax.random.normal(keys[2 * l + 1], (1, hidden_channels), jnp.float32)
        gnn_w.append(w)
        gnn_b.append(b)
        c_in = hidden_channels
    w_cls = 0.1 * jax.random.normal(keys[-2], (1, hidden_channels), jnp.float32)
    b_cls = 0.05 * jax.random.normal(keys[-1], (1, 1), jnp.float32)
    return gnn_w, gnn_b, w_cls, b_cls


# ----------------------------------------------------------------------------- main
if __name__ == "__main__":
    # Small shapes consistent with the module's forward:
    #   x: (num_nodes, in_channels), edge_index: (2, E), batch: (num_nodes,)
    num_nodes = 16
    in_channels = 4
    hidden_channels = 32
    gnn_layers = 3
    num_graphs = 2

    key = jax.random.PRNGKey(0)
    k_x, k_p = jax.random.split(key)

    x = jax.random.normal(k_x, (num_nodes, in_channels), jnp.float32)

    # Two 8-node ring graphs (both edge directions), deterministic.
    edges = []
    for gidx in range(num_graphs):
        base = gidx * 8
        for i in range(8):
            u, v = base + i, base + (i + 1) % 8
            edges.append((u, v))
            edges.append((v, u))
    edge_index = jnp.array(edges, dtype=jnp.int32).T          # (2, E)
    batch = jnp.repeat(jnp.arange(num_graphs, dtype=jnp.int32), 8)

    a_hat = build_normalized_adjacency(edge_index, num_nodes)
    pool_mat = build_mean_pool_matrix(batch, num_graphs, num_nodes)
    gnn_w, gnn_b, w_cls, b_cls = init_params(k_p, in_channels, hidden_channels, gnn_layers)

    prep = prepare_inputs(a_hat, x, gnn_w, gnn_b, pool_mat, w_cls, b_cls)
    out = fused_pallas_forward(prep)
    out = jax.block_until_ready(out)
    assert out.shape == (num_graphs, 1)

    # Strict check against a pure-JAX mirror of the same (folded / padded / bf16) math.
    ref_fused = fused_reference(prep)
    assert jnp.allclose(out, ref_fused, atol=2e-3, rtol=2e-3), (out, ref_fused)

    # Loose check against the original unfused full-f32 module math (bf16 rounding only).
    ref_f32 = reference_forward_f32(a_hat, x, gnn_w, gnn_b, pool_mat, w_cls, b_cls)
    assert jnp.allclose(out, ref_f32, atol=2e-2, rtol=2e-2), (out, ref_f32)

    print("KERNEL_OK")
</pallas_src>

<mosaic_0001>
module attributes {stable_mosaic.version = 11 : i64} {
  func.func @kernel(%arg0: i32, %arg1: i32, %arg2: i32, %arg3: memref<128x128xbf16, #tpu.memory_space<vmem>>, %arg4: memref<128x128xbf16, #tpu.memory_space<vmem>>, %arg5: memref<1x128xf32, #tpu.memory_space<vmem>>, %arg6: memref<1x128x128xbf16, #tpu.memory_space<vmem>>, %arg7: memref<1x1x128xf32, #tpu.memory_space<vmem>>, %arg8: memref<8x128xbf16, #tpu.memory_space<vmem>>, %arg9: memref<1x128xf32, #tpu.memory_space<vmem>>, %arg10: memref<1x1xf32, #tpu.memory_space<vmem>>, %arg11: memref<8x1xf32, #tpu.memory_space<vmem>>, %arg12: memref<128x128xf32, #tpu.memory_space<vmem>>, %arg13: memref<2x128x128xf32, #tpu.memory_space<vmem>>, %arg14: memref<8x128xf32, #tpu.memory_space<vmem>>) attributes {dimension_semantics = [#tpu.dimension_semantics<arbitrary>, #tpu.dimension_semantics<arbitrary>, #tpu.dimension_semantics<arbitrary>], iteration_bounds = array<i64: 2, 1, 1>, scalar_prefetch = 0 : i64, scratch_operands = 3 : i64, tpu.core_type = #tpu.core_type<tc>, window_params = [{transform_indices = @transform_0, window_bounds = array<i64: 128, 128>}, {pipeline_mode = #tpu.pipeline_mode<synchronous>, transform_indices = @transform_1, window_bounds = array<i64: 128, 128>}, {pipeline_mode = #tpu.pipeline_mode<synchronous>, transform_indices = @transform_2, window_bounds = array<i64: 1, 128>}, {pipeline_mode = #tpu.pipeline_mode<synchronous>, transform_indices = @transform_3, window_bounds = array<i64: 1, 128, 128>}, {pipeline_mode = #tpu.pipeline_mode<synchronous>, transform_indices = @transform_4, window_bounds = array<i64: 1, 1, 128>}, {pipeline_mode = #tpu.pipeline_mode<synchronous>, transform_indices = @transform_5, window_bounds = array<i64: 8, 128>}, {pipeline_mode = #tpu.pipeline_mode<synchronous>, transform_indices = @transform_6, window_bounds = array<i64: 1, 128>}, {pipeline_mode = #tpu.pipeline_mode<synchronous>, transform_indices = @transform_7, window_bounds = array<i64: 1, 1>}, {pipeline_mode = #tpu.pipeline_mode<synchronous>, transform_indices = @transform_8, window_bounds = array<i64: 8, 1>}]} {
    %c0_i32 = arith.constant 0 : i32
    %0 = arith.cmpi eq, %arg0, %c0_i32 : i32
    %c0_i32_0 = arith.constant 0 : i32
    %1 = arith.cmpi eq, %arg1, %c0_i32_0 : i32
    %2 = arith.andi %0, %1 : i1
    %c0_i32_1 = arith.constant 0 : i32
    %3 = arith.cmpi eq, %arg2, %c0_i32_1 : i32
    %4 = arith.andi %2, %3 : i1
    %5 = arith.extui %4 : i1 to i32
    %c0_i32_2 = arith.constant 0 : i32
    %6 = arith.cmpi ne, %5, %c0_i32_2 : i32
    scf.if %6 {
      %cst = arith.constant 0.000000e+00 : f32
      %22 = vector.broadcast %cst : f32 to vector<8x128xf32>
      %c0_12 = arith.constant 0 : index
      %c0_13 = arith.constant 0 : index
      %23 = vector.load %arg14[%c0_12, %c0_13] : memref<8x128xf32, #tpu.memory_space<vmem>>, vector<8x128xf32>
      tpu.vector_store %arg14[%c0_12, %c0_13], %22 {strides = array<i32>} : memref<8x128xf32, #tpu.memory_space<vmem>>, vector<8x128xf32>,
    } else {
    }
    %c0_i32_3 = arith.constant 0 : i32
    %7 = arith.cmpi eq, %arg2, %c0_i32_3 : i32
    %8 = arith.extui %7 : i1 to i32
    %c0_i32_4 = arith.constant 0 : i32
    %9 = arith.cmpi ne, %8, %c0_i32_4 : i32
    scf.if %9 {
      %cst = arith.constant 0.000000e+00 : f32
      %22 = vector.broadcast %cst : f32 to vector<128x128xf32>
      %c0_12 = arith.constant 0 : index
      %c0_13 = arith.constant 0 : index
      %23 = vector.load %arg12[%c0_12, %c0_13] : memref<128x128xf32, #tpu.memory_space<vmem>>, vector<128x128xf32>
      tpu.vector_store %arg12[%c0_12, %c0_13], %22 {strides = array<i32>} : memref<128x128xf32, #tpu.memory_space<vmem>>, vector<128x128xf32>,
    } else {
    }
    %c0 = arith.constant 0 : index
    %c0_5 = arith.constant 0 : index
    %10 = vector.load %arg3[%c0, %c0_5] : memref<128x128xbf16, #tpu.memory_space<vmem>>, vector<128x128xbf16>
    %c128_i32 = arith.constant 128 : i32
    %11 = arith.muli %arg2, %c128_i32 : i32
    %12 = tpu.assume_multiple %11, 128 : i32
    %c0_i32_6 = arith.constant 0 : i32
    %13 = arith.cmpi eq, %arg0, %c0_i32_6 : i32
    %14 = arith.extui %13 : i1 to i32
    %c0_i32_7 = arith.constant 0 : i32
    %15 = arith.cmpi ne, %14, %c0_i32_7 : i32
    scf.if %15 {
      %c0_12 = arith.constant 0 : index
      %c0_13 = arith.constant 0 : index
      %22 = vector.load %arg12[%c0_12, %c0_13] : memref<128x128xf32, #tpu.memory_space<vmem>>, vector<128x128xf32>
      %23 = arith.index_cast %12 : i32 to index
      %c0_14 = arith.constant 0 : index
      %24 = vector.load %arg4[%23, %c0_14] : memref<128x128xbf16, #tpu.memory_space<vmem>>, vector<128x128xbf16>
      %cst = arith.constant dense<0.000000e+00> : vector<128x128xf32>
      %25 = tpu.matmul %10, %24, %cst {dimension_numbers = #tpu.dot_dimension_numbers<[1], [0], [0], [1], [0, 0, 1, 1], [], []>} : vector<128x128xbf16>, vector<128x128xbf16>, vector<128x128xf32> -> vector<128x128xf32>
      %26 = arith.addf %22, %25 : vector<128x128xf32>
      %c0_15 = arith.constant 0 : index
      %c0_16 = arith.constant 0 : index
      %27 = vector.load %arg12[%c0_15, %c0_16] : memref<128x128xf32, #tpu.memory_space<vmem>>, vector<128x128xf32>
      tpu.vector_store %arg12[%c0_15, %c0_16], %26 {strides = array<i32>} : memref<128x128xf32, #tpu.memory_space<vmem>>, vector<128x128xf32>,
    } else {
    }
    %c0_i32_8 = arith.constant 0 : i32
    %16 = arith.cmpi sgt, %arg0, %c0_i32_8 : i32
    %17 = arith.extui %16 : i1 to i32
    %c0_i32_9 = arith.constant 0 : i32
    %18 = arith.cmpi ne, %17, %c0_i32_9 : i32
    scf.if %18 {
      %c1_i32 = arith.constant 1 : i32
      %22 = arith.addi %arg0, %c1_i32 : i32
      %c2_i32 = arith.constant 2 : i32
      %23 = arith.remsi %22, %c2_i32 : i32
      %24 = arith.index_cast %23 : i32 to index
      %25 = arith.index_cast %12 : i32 to index
      %c0_12 = arith.constant 0 : index
      %26 = vector.load %arg13[%24, %25, %c0_12] : memref<2x128x128xf32, #tpu.memory_space<vmem>>, vector<1x128x128xf32>
      %27 = vector.shape_cast %26 : vector<1x128x128xf32> to vector<128x128xf32>
      %28 = arith.truncf %27 : vector<128x128xf32> to vector<128x128xbf16>
      %c0_13 = arith.constant 0 : index
      %c0_14 = arith.constant 0 : index
      %29 = vector.load %arg12[%c0_13, %c0_14] : memref<128x128xf32, #tpu.memory_space<vmem>>, vector<128x128xf32>
      %cst = arith.constant dense<0.000000e+00> : vector<128x128xf32>
      %30 = tpu.matmul %10, %28, %cst {dimension_numbers = #tpu.dot_dimension_numbers<[1], [0], [0], [1], [0, 0, 1, 1], [], []>} : vector<128x128xbf16>, vector<128x128xbf16>, vector<128x128xf32> -> vector<128x128xf32>
      %31 = arith.addf %29, %30 : vector<128x128xf32>
      %c0_15 = arith.constant 0 : index
      %c0_16 = arith.constant 0 : index
      %32 = vector.load %arg12[%c0_15, %c0_16] : memref<128x128xf32, #tpu.memory_space<vmem>>, vector<128x128xf32>
      tpu.vector_store %arg12[%c0_15, %c0_16], %31 {strides = array<i32>} : memref<128x128xf32, #tpu.memory_space<vmem>>, vector<128x128xf32>,
    } else {
    }
    %c0_i32_10 = arith.constant 0 : i32
    %19 = arith.cmpi eq, %arg2, %c0_i32_10 : i32
    %20 = arith.extui %19 : i1 to i32
    %c0_i32_11 = arith.constant 0 : i32
    %21 = arith.cmpi ne, %20, %c0_i32_11 : i32
    scf.if %21 {
      %c128_i32_12 = arith.constant 128 : i32
      %22 = arith.muli %arg1, %c128_i32_12 : i32
      %23 = tpu.assume_multiple %22, 128 : i32
      %c0_i32_13 = arith.constant 0 : i32
      %24 = arith.cmpi eq, %arg0, %c0_i32_13 : i32
      %25 = arith.extui %24 : i1 to i32
      %c0_i32_14 = arith.constant 0 : i32
      %26 = arith.cmpi ne, %25, %c0_i32_14 : i32
      scf.if %26 {
        %c0_21 = arith.constant 0 : index
        %c0_22 = arith.constant 0 : index
        %38 = vector.load %arg12[%c0_21, %c0_22] : memref<128x128xf32, #tpu.memory_space<vmem>>, vector<128x128xf32>
        %c0_23 = arith.constant 0 : index
        %c0_24 = arith.constant 0 : index
        %39 = vector.load %arg5[%c0_23, %c0_24] : memref<1x128xf32, #tpu.memory_space<vmem>>, vector<1x128xf32>
        %40 = vector.broadcast %39 : vector<1x128xf32> to vector<128x128xf32>
        %41 = arith.addf %38, %40 : vector<128x128xf32>
        %cst = arith.constant 0.000000e+00 : f32
        %42 = vector.broadcast %cst : f32 to vector<128x128xf32>
        %43 = arith.maximumf %41, %42 : vector<128x128xf32>
        %c0_25 = arith.constant 0 : index
        %44 = arith.index_cast %23 : i32 to index
        %c0_26 = arith.constant 0 : index
        %45 = vector.load %arg13[%c0_25, %44, %c0_26] : memref<2x128x128xf32, #tpu.memory_space<vmem>>, vector<1x128x128xf32>
        %46 = vector.shape_cast %45 : vector<1x128x128xf32> to vector<128x128xf32>
        %47 = vector.shape_cast %43 : vector<128x128xf32> to vector<1x128x128xf32>
        tpu.vector_store %arg13[%c0_25, %44, %c0_26], %47 {strides = array<i32>} : memref<2x128x128xf32, #tpu.memory_space<vmem>>, vector<1x128x128xf32>,
      } else {
      }
      %c0_i32_15 = arith.constant 0 : i32
      %27 = arith.cmpi sgt, %arg0, %c0_i32_15 : i32
      %28 = arith.extui %27 : i1 to i32
      %c0_i32_16 = arith.constant 0 : i32
      %29 = arith.cmpi ne, %28, %c0_i32_16 : i32
      scf.if %29 {
        %c2_i32 = arith.constant 2 : i32
        %38 = arith.remsi %arg0, %c2_i32 : i32
        %c1_i32_21 = arith.constant 1 : i32
        %39 = arith.subi %arg0, %c1_i32_21 : i32
        %c0_i32_22 = arith.constant 0 : i32
        %40 = arith.maxsi %39, %c0_i32_22 : i32
        %c0_23 = arith.constant 0 : index
        %c0_24 = arith.constant 0 : index
        %41 = vector.load %arg12[%c0_23, %c0_24] : memref<128x128xf32, #tpu.memory_space<vmem>>, vector<128x128xf32>
        %42 = arith.truncf %41 : vector<128x128xf32> to vector<128x128xbf16>
        %43 = arith.index_cast %40 : i32 to index
        %c0_25 = arith.constant 0 : index
        %c0_26 = arith.constant 0 : index
        %44 = vector.load %arg6[%43, %c0_25, %c0_26] : memref<1x128x128xbf16, #tpu.memory_space<vmem>>, vector<1x128x128xbf16>
        %45 = vector.shape_cast %44 : vector<1x128x128xbf16> to vector<128x128xbf16>
        %cst = arith.constant dense<0.000000e+00> : vector<128x128xf32>
        %46 = tpu.matmul %42, %45, %cst {dimension_numbers = #tpu.dot_dimension_numbers<[1], [0], [0], [1], [0, 0, 1, 1], [], []>} : vector<128x128xbf16>, vector<128x128xbf16>, vector<128x128xf32> -> vector<128x128xf32>
        %47 = arith.index_cast %40 : i32 to index
        %c0_27 = arith.constant 0 : index
        %c0_28 = arith.constant 0 : index
        %48 = vector.load %arg7[%47, %c0_27, %c0_28] : memref<1x1x128xf32, #tpu.memory_space<vmem>>, vector<1x1x128xf32>
        %49 = vector.shape_cast %48 : vector<1x1x128xf32> to vector<1x128xf32>
        %50 = vector.broadcast %49 : vector<1x128xf32> to vector<128x128xf32>
        %51 = arith.addf %46, %50 : vector<128x128xf32>
        %cst_29 = arith.constant 0.000000e+00 : f32
        %52 = vector.broadcast %cst_29 : f32 to vector<128x128xf32>
        %53 = arith.maximumf %51, %52 : vector<128x128xf32>
        %54 = arith.index_cast %38 : i32 to index
        %55 = arith.index_cast %23 : i32 to index
        %c0_30 = arith.constant 0 : index
        %56 = vector.load %arg13[%54, %55, %c0_30] : memref<2x128x128xf32, #tpu.memory_space<vmem>>, vector<1x128x128xf32>
        %57 = vector.shape_cast %56 : vector<1x128x128xf32> to vector<128x128xf32>
        %58 = vector.shape_cast %53 : vector<128x128xf32> to vector<1x128x128xf32>
        tpu.vector_store %arg13[%54, %55, %c0_30], %58 {strides = array<i32>} : memref<2x128x128xf32, #tpu.memory_space<vmem>>, vector<1x128x128xf32>,
      } else {
      }
      %c1_i32 = arith.constant 1 : i32
      %30 = arith.cmpi eq, %arg0, %c1_i32 : i32
      %31 = arith.extui %30 : i1 to i32
      %c0_i32_17 = arith.constant 0 : i32
      %32 = arith.cmpi ne, %31, %c0_i32_17 : i32
      scf.if %32 {
        %c1 = arith.constant 1 : index
        %38 = arith.index_cast %23 : i32 to index
        %c0_21 = arith.constant 0 : index
        %39 = vector.load %arg13[%c1, %38, %c0_21] : memref<2x128x128xf32, #tpu.memory_space<vmem>>, vector<1x128x128xf32>
        %40 = vector.shape_cast %39 : vector<1x128x128xf32> to vector<128x128xf32>
        %41 = arith.truncf %40 : vector<128x128xf32> to vector<128x128xbf16>
        %c0_22 = arith.constant 0 : index
        %c0_23 = arith.constant 0 : index
        %42 = vector.load %arg14[%c0_22, %c0_23] : memref<8x128xf32, #tpu.memory_space<vmem>>, vector<8x128xf32>
        %c0_24 = arith.constant 0 : index
        %43 = arith.index_cast %23 : i32 to index
        %44 = vector.load %arg8[%c0_24, %43] : memref<8x128xbf16, #tpu.memory_space<vmem>>, vector<8x128xbf16>
        %cst = arith.constant dense<0.000000e+00> : vector<8x128xf32>
        %45 = tpu.matmul %44, %41, %cst {dimension_numbers = #tpu.dot_dimension_numbers<[1], [0], [0], [1], [0, 0, 1, 1], [], []>} : vector<8x128xbf16>, vector<128x128xbf16>, vector<8x128xf32> -> vector<8x128xf32>
        %46 = arith.addf %42, %45 : vector<8x128xf32>
        %c0_25 = arith.constant 0 : index
        %c0_26 = arith.constant 0 : index
        %47 = vector.load %arg14[%c0_25, %c0_26] : memref<8x128xf32, #tpu.memory_space<vmem>>, vector<8x128xf32>
        tpu.vector_store %arg14[%c0_25, %c0_26], %46 {strides = array<i32>} : memref<8x128xf32, #tpu.memory_space<vmem>>, vector<8x128xf32>,
      } else {
      }
      %c1_i32_18 = arith.constant 1 : i32
      %33 = arith.cmpi eq, %arg0, %c1_i32_18 : i32
      %c0_i32_19 = arith.constant 0 : i32
      %34 = arith.cmpi eq, %arg1, %c0_i32_19 : i32
      %35 = arith.andi %33, %34 : i1
      %36 = arith.extui %35 : i1 to i32
      %c0_i32_20 = arith.constant 0 : i32
      %37 = arith.cmpi ne, %36, %c0_i32_20 : i32
      scf.if %37 {
        %c0_21 = arith.constant 0 : index
        %c0_22 = arith.constant 0 : index
        %38 = vector.load %arg14[%c0_21, %c0_22] : memref<8x128xf32, #tpu.memory_space<vmem>>, vector<8x128xf32>
        %c0_23 = arith.constant 0 : index
        %c0_24 = arith.constant 0 : index
        %39 = vector.load %arg9[%c0_23, %c0_24] : memref<1x128xf32, #tpu.memory_space<vmem>>, vector<1x128xf32>
        %40 = vector.broadcast %39 : vector<1x128xf32> to vector<8x128xf32>
        %41 = arith.mulf %38, %40 : vector<8x128xf32>
        %cst = arith.constant dense<0.000000e+00> : vector<8xf32>
        %42 = vector.multi_reduction <add>, %41, %cst [1] : vector<8x128xf32> to vector<8xf32>
        %43 = vector.shape_cast %42 : vector<8xf32> to vector<8x1xf32>
        %c0_25 = arith.constant 0 : index
        %c0_26 = arith.constant 0 : index
        %44 = vector.load %arg10[%c0_25, %c0_26] : memref<1x1xf32, #tpu.memory_space<vmem>>, vector<1x1xf32>
        %45 = vector.broadcast %44 : vector<1x1xf32> to vector<8x1xf32>
        %46 = arith.addf %43, %45 : vector<8x1xf32>
        %c0_27 = arith.constant 0 : index
        %c0_28 = arith.constant 0 : index
        %47 = vector.load %arg11[%c0_27, %c0_28] : memref<8x1xf32, #tpu.memory_space<vmem>>, vector<8x1xf32>
        tpu.vector_store %arg11[%c0_27, %c0_28], %46 {strides = array<i32>} : memref<8x1xf32, #tpu.memory_space<vmem>>, vector<8x1xf32>,
      } else {
      }
    } else {
    }
    return
  }
  func.func @transform_0(%arg0: i32, %arg1: i32, %arg2: i32) -> (i32, i32) {
    %c0_i32 = arith.constant 0 : i32
    return %arg1, %arg2 : i32, i32
  }
  func.func @transform_1(%arg0: i32, %arg1: i32, %arg2: i32) -> (i32, i32) {
    %c0_i32 = arith.constant 0 : i32
    %c0_i32_0 = arith.constant 0 : i32
    %c0_i32_1 = arith.constant 0 : i32
    return %c0_i32, %c0_i32_0 : i32, i32
  }
  func.func @transform_2(%arg0: i32, %arg1: i32, %arg2: i32) -> (i32, i32) {
    %c0_i32 = arith.constant 0 : i32
    %c0_i32_0 = arith.constant 0 : i32
    %c0_i32_1 = arith.constant 0 : i32
    return %c0_i32, %c0_i32_0 : i32, i32
  }
  func.func @transform_3(%arg0: i32, %arg1: i32, %arg2: i32) -> (i32, i32, i32) {
    %c0_i32 = arith.constant 0 : i32
    %c0_i32_0 = arith.constant 0 : i32
    %c0_i32_1 = arith.constant 0 : i32
    %c0_i32_2 = arith.constant 0 : i32
    return %c0_i32, %c0_i32_0, %c0_i32_1 : i32, i32, i32
  }
  func.func @transform_4(%arg0: i32, %arg1: i32, %arg2: i32) -> (i32, i32, i32) {
    %c0_i32 = arith.constant 0 : i32
    %c0_i32_0 = arith.constant 0 : i32
    %c0_i32_1 = arith.constant 0 : i32
    %c0_i32_2 = arith.constant 0 : i32
    return %c0_i32, %c0_i32_0, %c0_i32_1 : i32, i32, i32
  }
  func.func @transform_5(%arg0: i32, %arg1: i32, %arg2: i32) -> (i32, i32) {
    %c0_i32 = arith.constant 0 : i32
    %c0_i32_0 = arith.constant 0 : i32
    %c0_i32_1 = arith.constant 0 : i32
    return %c0_i32, %c0_i32_0 : i32, i32
  }
  func.func @transform_6(%arg0: i32, %arg1: i32, %arg2: i32) -> (i32, i32) {
    %c0_i32 = arith.constant 0 : i32
    %c0_i32_0 = arith.constant 0 : i32
    %c0_i32_1 = arith.constant 0 : i32
    return %c0_i32, %c0_i32_0 : i32, i32
  }
  func.func @transform_7(%arg0: i32, %arg1: i32, %arg2: i32) -> (i32, i32) {
    %c0_i32 = arith.constant 0 : i32
    %c0_i32_0 = arith.constant 0 : i32
    %c0_i32_1 = arith.constant 0 : i32
    return %c0_i32, %c0_i32_0 : i32, i32
  }
  func.func @transform_8(%arg0: i32, %arg1: i32, %arg2: i32) -> (i32, i32) {
    %c0_i32 = arith.constant 0 : i32
    %c0_i32_0 = arith.constant 0 : i32
    %c0_i32_1 = arith.constant 0 : i32
    return %c0_i32, %c0_i32_0 : i32, i32
  }
}

</mosaic_0001>

<bundles_post_ra>
// kernel: tpu_custom_call.1
= control target key start
LH: loop header
LB: loop body
LE: loop exit
PB: predicated region body
PF: predicated region fallthrough
CT: control target
= control target key end

     0   :  { %s2238_s0 = inlined_call_operand.hbm [shape: bf16[128,128], index: 0, kind: input, shape index: {}]   ;;  %s2239_s1 = inlined_call_operand.hbm [shape: bf16[128,128], index: 1, kind: input, shape index: {}]   ;;  %s2240_s2 = inlined_call_operand.vmem [shape: f32[1,128], index: 2, kind: input, shape index: {}]   ;;  %s2241_s3 = inlined_call_operand.hbm [shape: bf16[1,128,128], index: 3, kind: input, shape index: {}]   ;;  %s2242_s4 = inlined_call_operand.vmem [shape: f32[1,1,128], index: 4, kind: input, shape index: {}]   ;;  %s2243_s5 = inlined_call_operand.vmem [shape: bf16[8,128], index: 5, kind: input, shape index: {}]   ;;  %s2244_s6 = inlined_call_operand.vmem [shape: f32[1,128], index: 6, kind: input, shape index: {}]   ;;  %s2245_s7 = inlined_call_operand.<no memory space> [shape: f32[1,1], index: 7, kind: input, shape index: {}]   ;;  %s2246_s8 = inlined_call_operand.vmem [shape: f32[8,1], index: 8, kind: output, shape index: {}]  }
   0x1   :  { %v13_v0 = vstv %s2245_s7 }
   0x2   :  { %14 = vst [vmem:[#allocation5] sm:$0x1] %v13_v0 }
   0x3   :  { %15 = vsyncpa [#allocation7], 0 }
   0x4   :  { %16 = vsyncpa [#allocation9], 0  ;;  %s1951_s29 = smov 0   ;;  %s1953_s30 = smov 0  }
   0x5   :  { %s1955_s9 = smov 0  }
   0x6 LB: > { %s1398_s7 = sadd.s32 4294967295, %s1892_s9   ;;  %p1399_p0 = scmp.ge.s32.totalorder %s1892_s9, 1  ;;  %s1892_s9 = sphi %s1955_s9, %s22_s9   ;;  %s1888_s30 = sphi %s1953_s30, %s2258_s30   ;;  %s1884_s29 = sphi %s1951_s29, %s2257_s29  }
   0x7   : > { %p242_p1 = scmp.lt.s32.totalorder %s1892_s9, 3  ;;  %p1969_p2 = scmp.eq.s32.totalorder %s1398_s7, 0 }
   0x8   : > { %s1894_s12 = smov [#allocation8]   ;;  %s41_s15 = sadd.s32 1, %s1888_s30 }
   0x9   : > { %s2250_s10 = scalar_select %p1969_p2, 1, 0 }
   0xa   : > { %p1973_p3 = pnand %p1399_p0, %p242_p1  ;;  %s271_s13 = sshll.u32 %s1894_s12, 4  ;;  %s1977_s13 = int_to_ptr.vmem [resolvable:$true] %s271_s13 }
   0xb   : > { %p1988_p6 = scmp.ge.s32.totalorder %s41_s15, 2  ;;  %s1895_s17 = smov [#allocation6]  }
   0xc   : > { %s2251_s11 = scalar_select %p1973_p3, 1, 0 }
   0xd   : > { %p1713_p4 = pneg %p1973_p3  ;;  %s258_s18 = sshll.u32 %s1895_s17, 4  ;;  %s259_s18 = int_to_ptr.vmem [resolvable:$true] %s258_s18 }
   0xe   : > { %s1778_s21 = scalar_lea.hbm %s2239_s1, 1024 }
   0xf   : > { %p1983_p5 = pnand %p1969_p2, %p1713_p4  ;;  %p1779_p7 = scmp.ne.s32.totalorder %s2239_s1, %s1778_s21 }
  0x10   : > { %p1785_p11 = scmp.lt.u32.totalorder %s1778_s21, %s2239_s1 }
  0x11   : > { %p2000_p8 = pneg %p1983_p5 }
  0x13   : > { %p1781_p9 = pnand %p2000_p8, %p1779_p7 }
  0x15   : > { %p1782_p10 = pneg %p1781_p9 }
  0x17   : > { %p1787_p12 = pnand %p1785_p11, %p1782_p10 }
  0x19   : > { %1790 = shalt.err (!%p1787_p12)
}
  0x1a   : > { %s1791_s27 = scalar_lea.vmem %s1977_s13, 1024  ;;  %p1799_p4 = scmp.lt.s32.totalorder %s1977_s13, %s1977_s13 }
  0x1b   : > { %p1792_p13 = scmp.ne.s32.totalorder %s1977_s13, %s1791_s27  ;;  %p1800_p2 = scmp.lt.s32.totalorder %s1791_s27, %s1791_s27 }
  0x1d   : > { %p1794_p0 = pnand %p1792_p13, %p2000_p8  ;;  %p1801_p7 = por %p1800_p2, %p1799_p4 }
  0x1f   : > { %p1795_p1 = pneg %p1794_p0 }
  0x21   : > { %p1802_p9 = pnand %p1801_p7, %p1795_p1 }
  0x23   : > { %1805 = shalt.err (!%p1802_p9)
}
  0x24   : > { %s1896_s28 = smov 64   ;;  %s1897_s7 = smov 4  }
  0x25   : > { %1719 = dma.hbm_to_vmem [thread:$0]  (!%p1983_p5), %s2239_s1, 1024, %s1977_s13, [#allocation9], %s1896_s28, %s1896_s28, %s1897_s7  }
  0x26   : > { %s2260_s15 = smov (%p1988_p6, %s41_s15), 0  ;;  %s1806_s21 = scalar_lea.hbm %s2238_s0, 1024 }
  0x27   : > { %p1807_p2 = scmp.ne.s32.totalorder %s2238_s0, %s1806_s21  ;;  %p1813_p12 = scmp.lt.u32.totalorder %s1806_s21, %s2238_s0 }
  0x29   : > { %p1809_p10 = pnand %p1807_p2, %p2000_p8 }
  0x2b   : > { %p1810_p11 = pneg %p1809_p10 }
  0x2d   : > { %p1815_p13 = pnand %p1813_p12, %p1810_p11 }
  0x2f   : > { %1818 = shalt.err (!%p1815_p13)
}
  0x30   : > { %s1819_s13 = scalar_lea.vmem %s259_s18, 1024  ;;  %p1827_p4 = scmp.lt.s32.totalorder %s259_s18, %s259_s18 }
  0x31   : > { %p1820_p6 = scmp.ne.s32.totalorder %s259_s18, %s1819_s13  ;;  %p1828_p7 = scmp.lt.s32.totalorder %s1819_s13, %s1819_s13 }
  0x33   : > { %p1822_p0 = pnand %p1820_p6, %p2000_p8  ;;  %p1829_p9 = por %p1828_p7, %p1827_p4 }
  0x35   : > { %p1823_p1 = pneg %p1822_p0 }
  0x37   : > { %p1830_p3 = pnand %p1829_p9, %p1823_p1 }
  0x39   : > { %1833 = shalt.err (!%p1830_p3)
}
  0x3a   : > { %1716 = dma.hbm_to_vmem [thread:$0]  (!%p1983_p5), %s2238_s0, 1024, %s259_s18, [#allocation7], %s1896_s28, %s1896_s28, %s1897_s7  }
  0x3b   : > { %s1898_s12 = smov [#allocation10]   ;;  %s1834_s21 = scalar_lea.hbm %s2241_s3, 1024 }
  0x3c   : > { %s287_s17 = sshll.u32 %s1898_s12, 4  ;;  %p1835_p3 = scmp.ne.s32.totalorder %s2241_s3, %s1834_s21  ;;  %s288_s17 = int_to_ptr.vmem [resolvable:$true] %s287_s17 }
  0x3d   : > { %p1841_p11 = scmp.lt.u32.totalorder %s1834_s21, %s2241_s3 }
  0x3e   : > { %p1837_p2 = pnand %p1835_p3, %p2000_p8 }
  0x40   : > { %p1838_p10 = pneg %p1837_p2 }
  0x42   : > { %p1843_p12 = pnand %p1841_p11, %p1838_p10 }
  0x44   : > { %1846 = shalt.err (!%p1843_p12)
}
  0x45   : > { %s1847_s18 = scalar_lea.vmem %s288_s17, 1024  ;;  %p1855_p1 = scmp.lt.s32.totalorder %s288_s17, %s288_s17 }
  0x46   : > { %p1848_p13 = scmp.ne.s32.totalorder %s288_s17, %s1847_s18  ;;  %p1856_p4 = scmp.lt.s32.totalorder %s1847_s18, %s1847_s18 }
  0x48   : > { %p1850_p6 = pnand %p1848_p13, %p2000_p8  ;;  %p1857_p7 = por %p1856_p4, %p1855_p1 }
  0x4a   : > { %p1851_p0 = pneg %p1850_p6 }
  0x4c   : > { %p1858_p9 = pnand %p1857_p7, %p1851_p0 }
  0x4e   : > { %1861 = shalt.err (!%p1858_p9)
}
  0x4f   : > { %1722 = dma.hbm_to_vmem [thread:$0]  (!%p1983_p5), %s2241_s3, 1024, %s288_s17, [#allocation9], %s1896_s28, %s1896_s28, %s1897_s7  }
  0x50   : > { %p2255_p3 = scmp.ne.s32.totalorder %s2251_s11, 0 }
  0x51   : > { %p2256_p8 = scmp.ne.s32.totalorder (!%p2255_p3), %s2250_s10, 0 }
  0x52   : > { %315 = sbr.rel (%p2255_p3) target bundleno = 1335 (0x537), region = 52 }
  0x59   : > { %1875 = dma.done.wait (%p2256_p8), [#allocation7], 1024  }
  0x5a   : > { %1877 = vsyncadd (%p2256_p8), [#allocation7], 4294966272 }
  0x5b   : > { %1879 = dma.done.wait (%p2256_p8), [#allocation9], 2048  }
  0x5c   : > { %1881 = vsyncadd (%p2256_p8), [#allocation9], 4294965248  ;;  %p349_p2 = scmp.eq.s32.totalorder %s1884_s29, 0 }
  0x5d   : > { %v1899_v1 = vmov (%p349_p2), 0.0  }
  0x5e   : > { %357 = sbr.rel (!%p349_p2) target bundleno = 101 (0x65), region = 68  ;;  %358 = vst [vmem:[#allocation4] sm:$0xff] (%p349_p2), %v1899_v1 }
  0x65 PF: > { %v2081_v2 = vld [vmem:[#allocation6] sm:$0xf]  ;;  %v2083_v3 = vld [vmem:[#allocation6 + $0x4] sm:$0xf]  ;;  %v1900_v4 = vmov 0.0   ;;  %p1409_p5 = scmp.ne.s32.totalorder %s1884_s29, 0 }
  0x66   : > { %362 = vst [vmem:[#allocation2] sm:$0xff] %v1900_v4  ;;  %363 = vst [vmem:[#allocation2 + $0x8] sm:$0xff] %v1900_v4  ;;  %v2085_v5 = vld [vmem:[#allocation6 + $0x8] sm:$0xf]  ;;  %v2087_v6 = vld [vmem:[#allocation6 + $0xc] sm:$0xf]  ;;  %v1410_v21 = vcombine.low (!%p1409_p5), %v2081_v2, %v2083_v3 }
  0x67   : > { %364 = vst [vmem:[#allocation2 + $0x10] sm:$0xff] %v1900_v4  ;;  %365 = vst [vmem:[#allocation2 + $0x18] sm:$0xff] %v1900_v4  ;;  %v2089_v7 = vld [vmem:[#allocation6 + $0x10] sm:$0xf]  ;;  %v2091_v8 = vld [vmem:[#allocation6 + $0x14] sm:$0xf]  ;;  %v1411_v29 = vcombine.low (!%p1409_p5), %v2085_v5, %v2087_v6 }
  0x68   : > { %366 = vst [vmem:[#allocation2 + $0x20] sm:$0xff] %v1900_v4  ;;  %367 = vst [vmem:[#allocation2 + $0x28] sm:$0xff] %v1900_v4  ;;  %v2093_v9 = vld [vmem:[#allocation6 + $0x18] sm:$0xf]  ;;  %v2095_v10 = vld [vmem:[#allocation6 + $0x1c] sm:$0xf]  ;;  %1553 = vmatprep.mubr.bf16.mxu0 (!%p1409_p5), %v1410_v21  ;;  %v1412_v31 = vcombine.low (!%p1409_p5), %v2089_v7, %v2091_v8 }
  0x69   : > { %368 = vst [vmem:[#allocation2 + $0x30] sm:$0xff] %v1900_v4  ;;  %369 = vst [vmem:[#allocation2 + $0x38] sm:$0xff] %v1900_v4  ;;  %v2097_v11 = vld [vmem:[#allocation6 + $0x20] sm:$0xf]  ;;  %v2099_v12 = vld [vmem:[#allocation6 + $0x24] sm:$0xf]  ;;  %v1413_v33 = vcombine.low (!%p1409_p5), %v2093_v9, %v2095_v10 }
  0x6a   : > { %370 = vst [vmem:[#allocation2 + $0x40] sm:$0xff] %v1900_v4  ;;  %371 = vst [vmem:[#allocation2 + $0x48] sm:$0xff] %v1900_v4  ;;  %v2101_v13 = vld [vmem:[#allocation6 + $0x28] sm:$0xf]  ;;  %v2103_v14 = vld [vmem:[#allocation6 + $0x2c] sm:$0xf]  ;;  %v1414_v22 = vcombine.low (!%p1409_p5), %v2097_v11, %v2099_v12 }
  0x6b   : > { %372 = vst [vmem:[#allocation2 + $0x50] sm:$0xff] %v1900_v4  ;;  %373 = vst [vmem:[#allocation2 + $0x58] sm:$0xff] %v1900_v4  ;;  %v2105_v15 = vld [vmem:[#allocation6 + $0x30] sm:$0xf]  ;;  %v2107_v16 = vld [vmem:[#allocation6 + $0x34] sm:$0xf]  ;;  %v1415_v30 = vcombine.low (!%p1409_p5), %v2101_v13, %v2103_v14 }
  0x6c   : > { %374 = vst [vmem:[#allocation2 + $0x60] sm:$0xff] %v1900_v4  ;;  %375 = vst [vmem:[#allocation2 + $0x68] sm:$0xff] %v1900_v4  ;;  %v2109_v17 = vld [vmem:[#allocation6 + $0x38] sm:$0xf]  ;;  %v2111_v18 = vld [vmem:[#allocation6 + $0x3c] sm:$0xf]  ;;  %1561 = vmatprep.mubr.bf16.mxu1 (!%p1409_p5), %v1414_v22  ;;  %v1416_v32 = vcombine.low (!%p1409_p5), %v2105_v15, %v2107_v16 }
  0x6d   : > { %376 = vst [vmem:[#allocation2 + $0x70] sm:$0xff] %v1900_v4  ;;  %377 = vst [vmem:[#allocation2 + $0x78] sm:$0xff] %v1900_v4  ;;  %397 = sbr.rel (%p1409_p5) target bundleno = 368 (0x170), region = 76  ;;  %v1762_v19 = vld [vmem:[#allocation8] sm:$0xff] (!%p1409_p5)   ;;  %v1763_v20 = vld [vmem:[#allocation8 + $0x8] sm:$0xff] (!%p1409_p5)   ;;  %v1417_v34 = vcombine.low (!%p1409_p5), %v2109_v17, %v2111_v18 }
  0x6e   : > { %1537 = vmatprep.subr.bf16.mxu0 (!%p1409_p5), %v1762_v19  ;;  %1653 = vmatprep.subr.bf16.mxu1 (!%p1409_p5), %v1762_v19  ;;  %v1764_v23 = vld [vmem:[#allocation8 + $0x10] sm:$0xff] (!%p1409_p5)   ;;  %v1765_v24 = vld [vmem:[#allocation8 + $0x18] sm:$0xff] (!%p1409_p5)   ;;  %v1766_v25 = vld [vmem:[#allocation8 + $0x20] sm:$0xff] (!%p1409_p5)  }
  0x6f   : > { %1538 = vmatpush3.bf16.msra.mxu0 (!%p1409_p5), %v1762_v19  ;;  %1661 = vmatpush3.bf16.msra.mxu1 (!%p1409_p5), %v1762_v19  ;;  %v1767_v26 = vld [vmem:[#allocation8 + $0x28] sm:$0xff] (!%p1409_p5)   ;;  %v1768_v27 = vld [vmem:[#allocation8 + $0x30] sm:$0xff] (!%p1409_p5)   ;;  %v1769_v28 = vld [vmem:[#allocation8 + $0x38] sm:$0xff] (!%p1409_p5)  }
  0x70   : > { %1539 = vmatprep.subr.bf16.mxu0 (!%p1409_p5), %v1763_v20  ;;  %1654 = vmatprep.subr.bf16.mxu1 (!%p1409_p5), %v1763_v20  ;;  %v400_v35 = vld [vmem:[#allocation2 + $0x10] sm:$0xff] (!%p1409_p5)  ;;  %v398_v37 = vld [vmem:[#allocation2] sm:$0xff] (!%p1409_p5)  ;;  %v401_v41 = vld [vmem:[#allocation2 + $0x18] sm:$0xff] (!%p1409_p5) }
  0x71   : > { %v406_v38 = vld [vmem:[#allocation2 + $0x40] sm:$0xff] (!%p1409_p5)  ;;  %v399_v47 = vld [vmem:[#allocation2 + $0x8] sm:$0xff] (!%p1409_p5)  ;;  %v404_v59 = vld [vmem:[#allocation2 + $0x30] sm:$0xff] (!%p1409_p5) }
  0x72   : > { %v408_v36 = vld [vmem:[#allocation2 + $0x50] sm:$0xff] (!%p1409_p5)  ;;  %v409_v42 = vld [vmem:[#allocation2 + $0x58] sm:$0xff] (!%p1409_p5)  ;;  %v407_v48 = vld [vmem:[#allocation2 + $0x48] sm:$0xff] (!%p1409_p5) }
  0x73   : > { %1540 = vmatpush3.bf16.msra.mxu0 (!%p1409_p5), %v1763_v20  ;;  %1662 = vmatpush3.bf16.msra.mxu1 (!%p1409_p5), %v1763_v20  ;;  %v402_v61 = vld [vmem:[#allocation2 + $0x20] sm:$0xff] (!%p1409_p5)  ;;  %v405_v1 = vld [vmem:[#allocation2 + $0x38] sm:$0xff] (!%p1409_p5) }
  0x74   : > { %1541 = vmatprep.subr.bf16.mxu0 %v1764_v23  ;;  %1655 = vmatprep.subr.bf16.mxu1 %v1764_v23  ;;  %v412_v60 = vld [vmem:[#allocation2 + $0x70] sm:$0xff]  ;;  %v410_v62 = vld [vmem:[#allocation2 + $0x60] sm:$0xff]  ;;  %v413_v4 = vld [vmem:[#allocation2 + $0x78] sm:$0xff] }
  0x77   : > { %1542 = vmatpush3.bf16.msra.mxu0 %v1764_v23  ;;  %1663 = vmatpush3.bf16.msra.mxu1 %v1764_v23  ;;  %v403_v23 = vld [vmem:[#allocation2 + $0x28] sm:$0xff] }
  0x78   : > { %1543 = vmatprep.subr.bf16.mxu0 %v1765_v24  ;;  %1656 = vmatprep.subr.bf16.mxu1 %v1765_v24 }
  0x7b   : > { %1544 = vmatpush3.bf16.msra.mxu0 %v1765_v24  ;;  %1664 = vmatpush3.bf16.msra.mxu1 %v1765_v24  ;;  %v411_v24 = vld [vmem:[#allocation2 + $0x68] sm:$0xff] }
  0x7c   : > { %1545 = vmatprep.subr.bf16.mxu0 %v1766_v25  ;;  %1657 = vmatprep.subr.bf16.mxu1 %v1766_v25 }
  0x7f   : > { %1546 = vmatpush3.bf16.msra.mxu0 %v1766_v25  ;;  %1665 = vmatpush3.bf16.msra.mxu1 %v1766_v25 }
  0x80   : > { %1547 = vmatprep.subr.bf16.mxu0 %v1767_v26  ;;  %1658 = vmatprep.subr.bf16.mxu1 %v1767_v26 }
  0x83   : > { %1548 = vmatpush3.bf16.msra.mxu0 %v1767_v26  ;;  %1666 = vmatpush3.bf16.msra.mxu1 %v1767_v26 }
  0x84   : > { %1549 = vmatprep.subr.bf16.mxu0 %v1768_v27  ;;  %1659 = vmatprep.subr.bf16.mxu1 %v1768_v27 }
  0x87   : > { %1550 = vmatpush3.bf16.msra.mxu0 %v1768_v27  ;;  %1667 = vmatpush3.bf16.msra.mxu1 %v1768_v27 }
  0x88   : > { %1551 = vmatprep.subr.bf16.mxu0 %v1769_v28  ;;  %1660 = vmatprep.subr.bf16.mxu1 %v1769_v28 }
  0x8b   : > { %1552 = vmatpush3.bf16.msra.mxu0 %v1769_v28  ;;  %1668 = vmatpush3.bf16.msra.mxu1 %v1769_v28 }
  0x8e   : > { %1554 = vmatmul.mubr.bf16.vlgmr.msra.gmra.mrb[0].mxu0 %v1411_v29  ;;  %1562 = vmatmul.mubr.bf16.vlgmr.msra.gmra.mrb[0].mxu1 %v1415_v30 }
  0x8f   : > { %1557 = vmatprep.mubr.bf16.mxu0 %v1412_v31  ;;  %1565 = vmatprep.mubr.bf16.mxu1 %v1416_v32 }
  0x96   : > { %1558 = vmatmul.mubr.bf16.gmra.mrb[4].mxu0 %v1413_v33  ;;  %1566 = vmatmul.mubr.bf16.gmra.mrb[4].mxu1 %v1417_v34 }
 0x161   : > { %v1555_v39 = vpop.f32.mrb[0].mxu0  ;;  %v1563_v40 = vpop.f32.mrb[0].mxu1 }
 0x162   : > { %v629_v43 = vadd.f32 %v1555_v39, %v400_v35  ;;  %v637_v44 = vadd.f32 %v1563_v40, %v408_v36  ;;  %v564_v45 = vpop.f32.mrb[1].mxu0  ;;  %v596_v46 = vpop.f32.mrb[1].mxu1 }
 0x163   : > { %v627_v49 = vadd.f32 %v564_v45, %v398_v37  ;;  %v635_v50 = vadd.f32 %v596_v46, %v406_v38  ;;  %v1556_v51 = vpop.f32.mrb[2].mxu0  ;;  %v1564_v52 = vpop.f32.mrb[2].mxu1 }
 0x164   : > { %645 = vst [vmem:[#allocation2 + $0x10] sm:$0xff] %v629_v43  ;;  %653 = vst [vmem:[#allocation2 + $0x50] sm:$0xff] %v637_v44  ;;  %v630_v53 = vadd.f32 %v1556_v51, %v401_v41  ;;  %v638_v54 = vadd.f32 %v1564_v52, %v409_v42  ;;  %v567_v55 = vpop.f32.mrb[3].mxu0  ;;  %v599_v56 = vpop.f32.mrb[3].mxu1 }
 0x165   : > { %643 = vst [vmem:[#allocation2] sm:$0xff] %v627_v49  ;;  %651 = vst [vmem:[#allocation2 + $0x40] sm:$0xff] %v635_v50  ;;  %v628_v57 = vadd.f32 %v567_v55, %v399_v47  ;;  %v636_v58 = vadd.f32 %v599_v56, %v407_v48 }
 0x166   : > { %646 = vst [vmem:[#allocation2 + $0x18] sm:$0xff] %v630_v53  ;;  %654 = vst [vmem:[#allocation2 + $0x58] sm:$0xff] %v638_v54 }
 0x167   : > { %644 = vst [vmem:[#allocation2 + $0x8] sm:$0xff] %v628_v57  ;;  %652 = vst [vmem:[#allocation2 + $0x48] sm:$0xff] %v636_v58 }
 0x169   : > { %v1559_v63 = vpop.f32.mrb[4].mxu0  ;;  %v1567_v0 = vpop.f32.mrb[4].mxu1 }
 0x16a   : > { %v633_v19 = vadd.f32 %v1559_v63, %v404_v59  ;;  %v641_v20 = vadd.f32 %v1567_v0, %v412_v60  ;;  %v580_v21 = vpop.f32.mrb[5].mxu0  ;;  %v612_v22 = vpop.f32.mrb[5].mxu1 }
 0x16b   : > { %v631_v25 = vadd.f32 %v580_v21, %v402_v61  ;;  %v639_v26 = vadd.f32 %v612_v22, %v410_v62  ;;  %v1560_v27 = vpop.f32.mrb[6].mxu0  ;;  %v1568_v28 = vpop.f32.mrb[6].mxu1 }
 0x16c   : > { %649 = vst [vmem:[#allocation2 + $0x30] sm:$0xff] %v633_v19  ;;  %657 = vst [vmem:[#allocation2 + $0x70] sm:$0xff] %v641_v20  ;;  %v634_v29 = vadd.f32 %v1560_v27, %v405_v1  ;;  %v642_v30 = vadd.f32 %v1568_v28, %v413_v4  ;;  %v583_v31 = vpop.f32.mrb[7].mxu0  ;;  %v615_v32 = vpop.f32.mrb[7].mxu1 }
 0x16d   : > { %647 = vst [vmem:[#allocation2 + $0x20] sm:$0xff] %v631_v25  ;;  %655 = vst [vmem:[#allocation2 + $0x60] sm:$0xff] %v639_v26  ;;  %v632_v33 = vadd.f32 %v583_v31, %v403_v23  ;;  %v640_v34 = vadd.f32 %v615_v32, %v411_v24 }
 0x16e   : > { %650 = vst [vmem:[#allocation2 + $0x38] sm:$0xff] %v634_v29  ;;  %658 = vst [vmem:[#allocation2 + $0x78] sm:$0xff] %v642_v30 }
 0x16f   : > { %648 = vst [vmem:[#allocation2 + $0x28] sm:$0xff] %v632_v33  ;;  %656 = vst [vmem:[#allocation2 + $0x68] sm:$0xff] %v640_v34 }
 0x170 PF: > { %p1426_p10 = scmp.le.s32.totalorder %s1884_s29, 0 }
 0x171   : > { %s663_s10 = sadd.s32 (!%p1426_p10), 1, %s1884_s29  ;;  %v1429_v35 = vcombine.low (!%p1426_p10), %v2081_v2, %v2083_v3  ;;  %v1433_v36 = vcombine.low (!%p1426_p10), %v2097_v11, %v2099_v12  ;;  %v1430_v57 = vcombine.low (!%p1426_p10), %v2085_v5, %v2087_v6  ;;  %v1434_v58 = vcombine.low (!%p1426_p10), %v2101_v13, %v2103_v14  ;;  %v699_v6 = vld [vmem:[#allocation2 + $0x10] sm:$0xff] (!%p1426_p10)  ;;  %v697_v14 = vld [vmem:[#allocation2] sm:$0xff] (!%p1426_p10)  ;;  %v700_v63 = vld [vmem:[#allocation2 + $0x18] sm:$0xff] (!%p1426_p10) }
 0x172   : > { %662 = sbr.rel (%p1426_p10) target bundleno = 641 (0x281), region = 80  ;;  %p664_p11 = scmp.lt.s32.totalorder (!%p1426_p10), %s663_s10, 0  ;;  %v1431_v59 = vcombine.low (!%p1426_p10), %v2089_v7, %v2091_v8  ;;  %v1435_v60 = vcombine.low (!%p1426_p10), %v2105_v15, %v2107_v16  ;;  %v1432_v61 = vcombine.low (!%p1426_p10), %v2093_v9, %v2095_v10  ;;  %v1436_v5 = vcombine.low (!%p1426_p10), %v2109_v17, %v2111_v18  ;;  %v707_v13 = vld [vmem:[#allocation2 + $0x50] sm:$0xff] (!%p1426_p10)  ;;  %v705_v62 = vld [vmem:[#allocation2 + $0x40] sm:$0xff] (!%p1426_p10)  ;;  %v708_v15 = vld [vmem:[#allocation2 + $0x58] sm:$0xff] (!%p1426_p10) }
 0x173   : > { %s665_s11 = ssub.s32 (!%p1426_p10), 0, %s663_s10  ;;  %1585 = vmatprep.mubr.bf16.mxu0 (!%p1426_p10), %v1429_v35  ;;  %1593 = vmatprep.mubr.bf16.mxu1 (!%p1426_p10), %v1433_v36  ;;  %v698_v19 = vld [vmem:[#allocation2 + $0x8] sm:$0xff] (!%p1426_p10)  ;;  %v703_v27 = vld [vmem:[#allocation2 + $0x30] sm:$0xff] (!%p1426_p10) }
 0x174   : > { %s1427_s14 = smin.u32 (!%p1426_p10), %s665_s11, %s663_s10  ;;  %v706_v20 = vld [vmem:[#allocation2 + $0x48] sm:$0xff] (!%p1426_p10)  ;;  %v711_v28 = vld [vmem:[#allocation2 + $0x70] sm:$0xff] (!%p1426_p10)  ;;  %v701_v29 = vld [vmem:[#allocation2 + $0x20] sm:$0xff] (!%p1426_p10) }
 0x175   : > { %s667_s24 = sand.u32 (!%p1426_p10), 1, %s1427_s14   ;;  %v709_v30 = vld [vmem:[#allocation2 + $0x60] sm:$0xff] (!%p1426_p10)  ;;  %v704_v33 = vld [vmem:[#allocation2 + $0x38] sm:$0xff] (!%p1426_p10) }
 0x176   : > { %s668_s28 = ssub.s32 (!%p1426_p10), 0, %s667_s24  ;;  %v712_v34 = vld [vmem:[#allocation2 + $0x78] sm:$0xff] (!%p1426_p10) }
 0x179   : > { %s2262_s28 = smov (!%p664_p11, %s668_s28), %s667_s24 }
 0x17a   : > { %s1428_s7 = sshll.u32 %s2262_s28, 7 }
 0x17b   : > { %s2140_s27 = scalar_lea.vmem [#allocation3], %s1428_s7 }
 0x17c   : > { %v673_v2 = vld [vmem:[%s2140_s27] sm:$0xff]  ;;  %v674_v3 = vld [vmem:[%s2140_s27 + $0x8] sm:$0xff]  ;;  %v675_v11 = vld [vmem:[%s2140_s27 + $0x10] sm:$0xff] }
 0x17d   : > { %v689_v12 = vpack.c.bf16 %v674_v3, %v673_v2  ;;  %v676_v37 = vld [vmem:[%s2140_s27 + $0x18] sm:$0xff]  ;;  %v677_v39 = vld [vmem:[%s2140_s27 + $0x20] sm:$0xff]  ;;  %v678_v40 = vld [vmem:[%s2140_s27 + $0x28] sm:$0xff] }
 0x17e   : > { %v690_v38 = vpack.c.bf16 %v676_v37, %v675_v11  ;;  %v691_v41 = vpack.c.bf16 %v678_v40, %v677_v39  ;;  %v679_v42 = vld [vmem:[%s2140_s27 + $0x30] sm:$0xff]  ;;  %v680_v43 = vld [vmem:[%s2140_s27 + $0x38] sm:$0xff]  ;;  %v681_v45 = vld [vmem:[%s2140_s27 + $0x40] sm:$0xff] }
 0x17f   : > { %1569 = vmatprep.subr.bf16.mxu0 %v689_v12  ;;  %1669 = vmatprep.subr.bf16.mxu1 %v689_v12  ;;  %v692_v44 = vpack.c.bf16 %v680_v43, %v679_v42  ;;  %v682_v46 = vld [vmem:[%s2140_s27 + $0x48] sm:$0xff]  ;;  %v683_v48 = vld [vmem:[%s2140_s27 + $0x50] sm:$0xff]  ;;  %v684_v49 = vld [vmem:[%s2140_s27 + $0x58] sm:$0xff] }
 0x180   : > { %1570 = vmatpush3.bf16.msra.mxu0 %v689_v12  ;;  %1677 = vmatpush3.bf16.msra.mxu1 %v689_v12  ;;  %v693_v47 = vpack.c.bf16 %v682_v46, %v681_v45  ;;  %v694_v50 = vpack.c.bf16 %v684_v49, %v683_v48  ;;  %v685_v51 = vld [vmem:[%s2140_s27 + $0x60] sm:$0xff]  ;;  %v686_v52 = vld [vmem:[%s2140_s27 + $0x68] sm:$0xff]  ;;  %v687_v54 = vld [vmem:[%s2140_s27 + $0x70] sm:$0xff] }
 0x181   : > { %1571 = vmatprep.subr.bf16.mxu0 %v690_v38  ;;  %1670 = vmatprep.subr.bf16.mxu1 %v690_v38  ;;  %v695_v53 = vpack.c.bf16 %v686_v52, %v685_v51  ;;  %v688_v55 = vld [vmem:[%s2140_s27 + $0x78] sm:$0xff]  ;;  %v702_v11 = vld [vmem:[#allocation2 + $0x28] sm:$0xff] }
 0x182   : > { %v696_v56 = vpack.c.bf16 %v688_v55, %v687_v54  ;;  %v710_v12 = vld [vmem:[#allocation2 + $0x68] sm:$0xff] }
 0x184   : > { %1572 = vmatpush3.bf16.msra.mxu0 %v690_v38  ;;  %1678 = vmatpush3.bf16.msra.mxu1 %v690_v38 }
 0x185   : > { %1573 = vmatprep.subr.bf16.mxu0 %v691_v41  ;;  %1671 = vmatprep.subr.bf16.mxu1 %v691_v41 }
 0x188   : > { %1574 = vmatpush3.bf16.msra.mxu0 %v691_v41  ;;  %1679 = vmatpush3.bf16.msra.mxu1 %v691_v41 }
 0x189   : > { %1575 = vmatprep.subr.bf16.mxu0 %v692_v44  ;;  %1672 = vmatprep.subr.bf16.mxu1 %v692_v44 }
 0x18c   : > { %1576 = vmatpush3.bf16.msra.mxu0 %v692_v44  ;;  %1680 = vmatpush3.bf16.msra.mxu1 %v692_v44 }
 0x18d   : > { %1577 = vmatprep.subr.bf16.mxu0 %v693_v47  ;;  %1673 = vmatprep.subr.bf16.mxu1 %v693_v47 }
 0x190   : > { %1578 = vmatpush3.bf16.msra.mxu0 %v693_v47  ;;  %1681 = vmatpush3.bf16.msra.mxu1 %v693_v47 }
 0x191   : > { %1579 = vmatprep.subr.bf16.mxu0 %v694_v50  ;;  %1674 = vmatprep.subr.bf16.mxu1 %v694_v50 }
 0x194   : > { %1580 = vmatpush3.bf16.msra.mxu0 %v694_v50  ;;  %1682 = vmatpush3.bf16.msra.mxu1 %v694_v50 }
 0x195   : > { %1581 = vmatprep.subr.bf16.mxu0 %v695_v53  ;;  %1675 = vmatprep.subr.bf16.mxu1 %v695_v53 }
 0x198   : > { %1582 = vmatpush3.bf16.msra.mxu0 %v695_v53  ;;  %1683 = vmatpush3.bf16.msra.mxu1 %v695_v53 }
 0x199   : > { %1583 = vmatprep.subr.bf16.mxu0 %v696_v56  ;;  %1676 = vmatprep.subr.bf16.mxu1 %v696_v56 }
 0x19c   : > { %1584 = vmatpush3.bf16.msra.mxu0 %v696_v56  ;;  %1684 = vmatpush3.bf16.msra.mxu1 %v696_v56 }
 0x19f   : > { %1586 = vmatmul.mubr.bf16.vlgmr.msra.gmra.mrb[0].mxu0 %v1430_v57  ;;  %1594 = vmatmul.mubr.bf16.vlgmr.msra.gmra.mrb[0].mxu1 %v1434_v58 }
 0x1a0   : > { %1589 = vmatprep.mubr.bf16.mxu0 %v1431_v59  ;;  %1597 = vmatprep.mubr.bf16.mxu1 %v1435_v60 }
 0x1a7   : > { %1590 = vmatmul.mubr.bf16.gmra.mrb[4].mxu0 %v1432_v61  ;;  %1598 = vmatmul.mubr.bf16.gmra.mrb[4].mxu1 %v1436_v5 }
 0x272   : > { %v1587_v7 = vpop.f32.mrb[0].mxu0  ;;  %v1595_v8 = vpop.f32.mrb[0].mxu1 }
 0x273   : > { %v860_v16 = vadd.f32 %v1587_v7, %v699_v6  ;;  %v868_v0 = vadd.f32 %v1595_v8, %v707_v13  ;;  %v795_v1 = vpop.f32.mrb[1].mxu0  ;;  %v827_v4 = vpop.f32.mrb[1].mxu1 }
 0x274   : > { %v858_v9 = vadd.f32 %v795_v1, %v697_v14  ;;  %v866_v10 = vadd.f32 %v827_v4, %v705_v62  ;;  %v1588_v21 = vpop.f32.mrb[2].mxu0  ;;  %v1596_v17 = vpop.f32.mrb[2].mxu1 }
 0x275   : > { %876 = vst [vmem:[#allocation2 + $0x10] sm:$0xff] %v860_v16  ;;  %884 = vst [vmem:[#allocation2 + $0x50] sm:$0xff] %v868_v0  ;;  %v861_v18 = vadd.f32 %v1588_v21, %v700_v63  ;;  %v869_v22 = vadd.f32 %v1596_v17, %v708_v15  ;;  %v798_v23 = vpop.f32.mrb[3].mxu0  ;;  %v830_v24 = vpop.f32.mrb[3].mxu1 }
 0x276   : > { %874 = vst [vmem:[#allocation2] sm:$0xff] %v858_v9  ;;  %882 = vst [vmem:[#allocation2 + $0x40] sm:$0xff] %v866_v10  ;;  %v859_v25 = vadd.f32 %v798_v23, %v698_v19  ;;  %v867_v26 = vadd.f32 %v830_v24, %v706_v20 }
 0x277   : > { %877 = vst [vmem:[#allocation2 + $0x18] sm:$0xff] %v861_v18  ;;  %885 = vst [vmem:[#allocation2 + $0x58] sm:$0xff] %v869_v22 }
 0x278   : > { %875 = vst [vmem:[#allocation2 + $0x8] sm:$0xff] %v859_v25  ;;  %883 = vst [vmem:[#allocation2 + $0x48] sm:$0xff] %v867_v26 }
 0x27a   : > { %v1591_v31 = vpop.f32.mrb[4].mxu0  ;;  %v1599_v32 = vpop.f32.mrb[4].mxu1 }
 0x27b   : > { %v864_v35 = vadd.f32 %v1591_v31, %v703_v27  ;;  %v872_v36 = vadd.f32 %v1599_v32, %v711_v28  ;;  %v811_v2 = vpop.f32.mrb[5].mxu0  ;;  %v843_v3 = vpop.f32.mrb[5].mxu1 }
 0x27c   : > { %v862_v37 = vadd.f32 %v811_v2, %v701_v29  ;;  %v870_v38 = vadd.f32 %v843_v3, %v709_v30  ;;  %v1592_v39 = vpop.f32.mrb[6].mxu0  ;;  %v1600_v40 = vpop.f32.mrb[6].mxu1 }
 0x27d   : > { %880 = vst [vmem:[#allocation2 + $0x30] sm:$0xff] %v864_v35  ;;  %888 = vst [vmem:[#allocation2 + $0x70] sm:$0xff] %v872_v36  ;;  %v865_v41 = vadd.f32 %v1592_v39, %v704_v33  ;;  %v873_v42 = vadd.f32 %v1600_v40, %v712_v34  ;;  %v814_v43 = vpop.f32.mrb[7].mxu0  ;;  %v846_v44 = vpop.f32.mrb[7].mxu1 }
 0x27e   : > { %878 = vst [vmem:[#allocation2 + $0x20] sm:$0xff] %v862_v37  ;;  %886 = vst [vmem:[#allocation2 + $0x60] sm:$0xff] %v870_v38  ;;  %v863_v45 = vadd.f32 %v814_v43, %v702_v11  ;;  %v871_v46 = vadd.f32 %v846_v44, %v710_v12 }
 0x27f   : > { %881 = vst [vmem:[#allocation2 + $0x38] sm:$0xff] %v865_v41  ;;  %889 = vst [vmem:[#allocation2 + $0x78] sm:$0xff] %v873_v42 }
 0x280   : > { %879 = vst [vmem:[#allocation2 + $0x28] sm:$0xff] %v863_v45  ;;  %887 = vst [vmem:[#allocation2 + $0x68] sm:$0xff] %v871_v46 }
 0x281 PF: > { %896 = sbr.rel (%p1409_p5) target bundleno = 655 (0x28f), region = 88  ;;  %v897_v47 = vld [vmem:[#allocation2] sm:$0xff] (!%p1409_p5)  ;;  %v898_v49 = vld [vmem:[#allocation2 + $0x8] sm:$0xff] (!%p1409_p5)  ;;  %v899_v52 = vld [vmem:[#allocation2 + $0x10] sm:$0xff] (!%p1409_p5) }
 0x282   : > { %v1438_v48 = vld [vmem:[%s2240_s2] ss:$0 sm:$0xff] (!%p1409_p5)  ;;  %v900_v53 = vld [vmem:[#allocation2 + $0x18] sm:$0xff] (!%p1409_p5)  ;;  %v906_v62 = vld [vmem:[#allocation2 + $0x48] sm:$0xff] (!%p1409_p5) }
 0x283   : > { %v920_v50 = vadd.f32 (!%p1409_p5), %v1438_v48, %v897_v47  ;;  %v921_v51 = vadd.f32 (!%p1409_p5), %v1438_v48, %v898_v49  ;;  %v922_v55 = vadd.f32 (!%p1409_p5), %v1438_v48, %v899_v52  ;;  %v923_v56 = vadd.f32 (!%p1409_p5), %v1438_v48, %v900_v53  ;;  %v905_v14 = vld [vmem:[#allocation2 + $0x40] sm:$0xff] (!%p1409_p5)  ;;  %v907_v7 = vld [vmem:[#allocation2 + $0x50] sm:$0xff] (!%p1409_p5)  ;;  %v908_v0 = vld [vmem:[#allocation2 + $0x58] sm:$0xff] (!%p1409_p5) }
 0x284   : > { %v903_v59 = vld [vmem:[#allocation2 + $0x30] sm:$0xff] (!%p1409_p5)  ;;  %v928_v9 = vadd.f32 (!%p1409_p5), %v1438_v48, %v905_v14  ;;  %v929_v10 = vadd.f32 (!%p1409_p5), %v1438_v48, %v906_v62  ;;  %v930_v22 = vadd.f32 (!%p1409_p5), %v1438_v48, %v907_v7  ;;  %v931_v23 = vadd.f32 (!%p1409_p5), %v1438_v48, %v908_v0 }
 0x285   : > { %v901_v54 = vld [vmem:[#allocation2 + $0x20] sm:$0xff] (!%p1409_p5)  ;;  %v936_v61 = vmax.f32 (!%p1409_p5), %v920_v50, 0.0  ;;  %v937_v5 = vmax.f32 (!%p1409_p5), %v921_v51, 0.0  ;;  %v926_v13 = vadd.f32 (!%p1409_p5), %v1438_v48, %v903_v59  ;;  %v938_v8 = vmax.f32 (!%p1409_p5), %v922_v55, 0.0  ;;  %v911_v21 = vld [vmem:[#allocation2 + $0x70] sm:$0xff] (!%p1409_p5) }
 0x286   : > { %v924_v57 = vadd.f32 (!%p1409_p5), %v1438_v48, %v901_v54  ;;  %v904_v60 = vld [vmem:[#allocation2 + $0x38] sm:$0xff] (!%p1409_p5)  ;;  %v939_v63 = vmax.f32 (!%p1409_p5), %v923_v56, 0.0  ;;  %v909_v1 = vld [vmem:[#allocation2 + $0x60] sm:$0xff] (!%p1409_p5)  ;;  %v944_v25 = vmax.f32 (!%p1409_p5), %v928_v9, 0.0  ;;  %v945_v26 = vmax.f32 (!%p1409_p5), %v929_v10, 0.0 }
 0x287   : > { %v902_v58 = vld [vmem:[#allocation2 + $0x28] sm:$0xff] (!%p1409_p5)  ;;  %v927_v16 = vadd.f32 (!%p1409_p5), %v1438_v48, %v904_v60  ;;  %953 = vst [vmem:[#allocation3] sm:$0xff] (!%p1409_p5), %v936_v61  ;;  %954 = vst [vmem:[#allocation3 + $0x8] sm:$0xff] (!%p1409_p5), %v937_v5  ;;  %v942_v20 = vmax.f32 (!%p1409_p5), %v926_v13, 0.0  ;;  %v912_v17 = vld [vmem:[#allocation2 + $0x78] sm:$0xff] (!%p1409_p5)  ;;  %v932_v24 = vadd.f32 (!%p1409_p5), %v1438_v48, %v909_v1  ;;  %v934_v28 = vadd.f32 (!%p1409_p5), %v1438_v48, %v911_v21 }
 0x288   : > { %v925_v6 = vadd.f32 %v1438_v48, %v902_v58  ;;  %v940_v15 = vmax.f32 %v924_v57, 0.0  ;;  %v910_v4 = vld [vmem:[#allocation2 + $0x68] sm:$0xff]  ;;  %955 = vst [vmem:[#allocation3 + $0x10] sm:$0xff] %v938_v8  ;;  %956 = vst [vmem:[#allocation3 + $0x18] sm:$0xff] %v939_v63  ;;  %v946_v29 = vmax.f32 %v930_v22, 0.0  ;;  %v947_v30 = vmax.f32 %v931_v23, 0.0 }
 0x289   : > { %v943_v18 = vmax.f32 %v927_v16, 0.0  ;;  %959 = vst [vmem:[#allocation3 + $0x30] sm:$0xff] %v942_v20  ;;  %v933_v27 = vadd.f32 %v1438_v48, %v910_v4  ;;  %v948_v31 = vmax.f32 %v932_v24, 0.0  ;;  %v935_v32 = vadd.f32 %v1438_v48, %v912_v17  ;;  %961 = vst [vmem:[#allocation3 + $0x40] sm:$0xff] %v944_v25 }
 0x28a   : > { %v941_v19 = vmax.f32 %v925_v6, 0.0  ;;  %957 = vst [vmem:[#allocation3 + $0x20] sm:$0xff] %v940_v15  ;;  %962 = vst [vmem:[#allocation3 + $0x48] sm:$0xff] %v945_v26  ;;  %v950_v34 = vmax.f32 %v934_v28, 0.0 }
 0x28b   : > { %960 = vst [vmem:[#allocation3 + $0x38] sm:$0xff] %v943_v18  ;;  %v949_v33 = vmax.f32 %v933_v27, 0.0  ;;  %963 = vst [vmem:[#allocation3 + $0x50] sm:$0xff] %v946_v29  ;;  %v951_v35 = vmax.f32 %v935_v32, 0.0 }
 0x28c   : > { %958 = vst [vmem:[#allocation3 + $0x28] sm:$0xff] %v941_v19  ;;  %964 = vst [vmem:[#allocation3 + $0x58] sm:$0xff] %v947_v30 }
 0x28d   : > { %965 = vst [vmem:[#allocation3 + $0x60] sm:$0xff] %v948_v31  ;;  %966 = vst [vmem:[#allocation3 + $0x68] sm:$0xff] %v949_v33 }
 0x28e   : > { %967 = vst [vmem:[#allocation3 + $0x70] sm:$0xff] %v950_v34  ;;  %968 = vst [vmem:[#allocation3 + $0x78] sm:$0xff] %v951_v35 }
 0x28f PF: > { %971 = sbr.rel (%p1426_p10) target bundleno = 926 (0x39e), region = 92  ;;  %s1441_s19 = sadd.s32 (!%p1426_p10), 4294967295, %s1884_s29  ;;  %v981_v36 = vld [vmem:[#allocation2] sm:$0xff] (!%p1426_p10)  ;;  %v982_v2 = vld [vmem:[#allocation2 + $0x8] sm:$0xff] (!%p1426_p10)  ;;  %v983_v46 = vld [vmem:[#allocation2 + $0x10] sm:$0xff] (!%p1426_p10) }
 0x290   : > { %v989_v3 = vld [vmem:[#allocation2 + $0x40] sm:$0xff] (!%p1426_p10)  ;;  %p979_p12 = scmp.gt.s32.totalorder (!%p1426_p10), %s1441_s19, 0  ;;  %v997_v11 = vpack.c.bf16 (!%p1426_p10), %v982_v2, %v981_v36  ;;  %v990_v12 = vld [vmem:[#allocation2 + $0x48] sm:$0xff] (!%p1426_p10)  ;;  %v984_v47 = vld [vmem:[#allocation2 + $0x18] sm:$0xff] (!%p1426_p10)  ;;  %s973_s22 = ssub.s32 (!%p1426_p10), 0, %s1884_s29 }
 0x291   : > { %v1001_v37 = vpack.c.bf16 (!%p1426_p10), %v990_v12, %v989_v3  ;;  %v991_v48 = vld [vmem:[#allocation2 + $0x50] sm:$0xff] (!%p1426_p10)  ;;  %v992_v49 = vld [vmem:[#allocation2 + $0x58] sm:$0xff] (!%p1426_p10)  ;;  %v985_v50 = vld [vmem:[#allocation2 + $0x20] sm:$0xff] (!%p1426_p10)  ;;  %v998_v54 = vpack.c.bf16 (!%p1426_p10), %v984_v47, %v983_v46  ;;  %s1440_s23 = smin.u32 (!%p1426_p10), %s1884_s29, %s973_s22  ;;  %p972_p13 = scmp.lt.s32.totalorder (!%p1426_p10), %s1884_s29, 0 }
 0x292   : > { %1617 = vmatprep.mubr.bf16.mxu0 (!%p1426_p10), %v997_v11  ;;  %v986_v51 = vld [vmem:[#allocation2 + $0x28] sm:$0xff] (!%p1426_p10)  ;;  %v993_v52 = vld [vmem:[#allocation2 + $0x60] sm:$0xff] (!%p1426_p10)  ;;  %v1002_v55 = vpack.c.bf16 (!%p1426_p10), %v992_v49, %v991_v48  ;;  %v987_v58 = vld [vmem:[#allocation2 + $0x30] sm:$0xff] (!%p1426_p10)  ;;  %s975_s25 = sand.u32 (!%p1426_p10), 1, %s1440_s23  }
 0x293   : > { %1625 = vmatprep.mubr.bf16.mxu1 (!%p1426_p10), %v1001_v37  ;;  %v994_v53 = vld [vmem:[#allocation2 + $0x68] sm:$0xff] (!%p1426_p10)  ;;  %v999_v56 = vpack.c.bf16 (!%p1426_p10), %v986_v51, %v985_v50  ;;  %v988_v59 = vld [vmem:[#allocation2 + $0x38] sm:$0xff] (!%p1426_p10)  ;;  %v995_v60 = vld [vmem:[#allocation2 + $0x70] sm:$0xff] (!%p1426_p10)  ;;  %s976_s26 = ssub.s32 (!%p1426_p10), 0, %s975_s25 }
 0x294   : > { %v1003_v57 = vpack.c.bf16 (!%p1426_p10), %v994_v53, %v993_v52  ;;  %v996_v61 = vld [vmem:[#allocation2 + $0x78] sm:$0xff] (!%p1426_p10)  ;;  %v1000_v5 = vpack.c.bf16 (!%p1426_p10), %v988_v59, %v987_v58 }
 0x295   : > { %v1004_v6 = vpack.c.bf16 (!%p1426_p10), %v996_v61, %v995_v60 }
 0x296   : > { %s2264_s19 = smov (!%p979_p12, %s1441_s19), 0  ;;  %s2266_s26 = smov (!%p972_p13, %s976_s26), %s975_s25 }
 0x297   : > { %s1478_s20 = sshll.u32 %s2264_s19, 6  ;;  %s1024_s16 = scalar_lea.vmem %s2242_s4, %s2264_s19 }
 0x298   : > { %s2181_s21 = scalar_lea.vmem [#allocation10], %s1478_s20  ;;  %v1444_v13 = vld [vmem:[%s1024_s16] ss:$0 sm:$0xff]  ;;  %s1453_s10 = sshll.u32 %s2266_s26, 7 }
 0x299   : > { %v1770_v38 = vld [vmem:[%s2181_s21] sm:$0xff]   ;;  %v1771_v39 = vld [vmem:[%s2181_s21 + $0x8] sm:$0xff]   ;;  %v1772_v40 = vld [vmem:[%s2181_s21 + $0x10] sm:$0xff]   ;;  %s2198_s11 = scalar_lea.vmem [#allocation3], %s1453_s10 }
 0x29a   : > { %1601 = vmatprep.subr.bf16.mxu0 %v1770_v38  ;;  %1685 = vmatprep.subr.bf16.mxu1 %v1770_v38  ;;  %v1773_v41 = vld [vmem:[%s2181_s21 + $0x18] sm:$0xff]   ;;  %v1774_v42 = vld [vmem:[%s2181_s21 + $0x20] sm:$0xff]   ;;  %v1775_v43 = vld [vmem:[%s2181_s21 + $0x28] sm:$0xff]  }
 0x29b   : > { %1602 = vmatpush3.bf16.msra.mxu0 %v1770_v38  ;;  %1693 = vmatpush3.bf16.msra.mxu1 %v1770_v38  ;;  %v1776_v44 = vld [vmem:[%s2181_s21 + $0x30] sm:$0xff]   ;;  %v1777_v45 = vld [vmem:[%s2181_s21 + $0x38] sm:$0xff]  }
 0x29c   : > { %1603 = vmatprep.subr.bf16.mxu0 %v1771_v39  ;;  %1686 = vmatprep.subr.bf16.mxu1 %v1771_v39 }
 0x29f   : > { %1604 = vmatpush3.bf16.msra.mxu0 %v1771_v39  ;;  %1694 = vmatpush3.bf16.msra.mxu1 %v1771_v39 }
 0x2a0   : > { %1605 = vmatprep.subr.bf16.mxu0 %v1772_v40  ;;  %1687 = vmatprep.subr.bf16.mxu1 %v1772_v40 }
 0x2a3   : > { %1606 = vmatpush3.bf16.msra.mxu0 %v1772_v40  ;;  %1695 = vmatpush3.bf16.msra.mxu1 %v1772_v40 }
 0x2a4   : > { %1607 = vmatprep.subr.bf16.mxu0 %v1773_v41  ;;  %1688 = vmatprep.subr.bf16.mxu1 %v1773_v41 }
 0x2a7   : > { %1608 = vmatpush3.bf16.msra.mxu0 %v1773_v41  ;;  %1696 = vmatpush3.bf16.msra.mxu1 %v1773_v41 }
 0x2a8   : > { %1609 = vmatprep.subr.bf16.mxu0 %v1774_v42  ;;  %1689 = vmatprep.subr.bf16.mxu1 %v1774_v42 }
 0x2ab   : > { %1610 = vmatpush3.bf16.msra.mxu0 %v1774_v42  ;;  %1697 = vmatpush3.bf16.msra.mxu1 %v1774_v42 }
 0x2ac   : > { %1611 = vmatprep.subr.bf16.mxu0 %v1775_v43  ;;  %1690 = vmatprep.subr.bf16.mxu1 %v1775_v43 }
 0x2af   : > { %1612 = vmatpush3.bf16.msra.mxu0 %v1775_v43  ;;  %1698 = vmatpush3.bf16.msra.mxu1 %v1775_v43 }
 0x2b0   : > { %1613 = vmatprep.subr.bf16.mxu0 %v1776_v44  ;;  %1691 = vmatprep.subr.bf16.mxu1 %v1776_v44 }
 0x2b3   : > { %1614 = vmatpush3.bf16.msra.mxu0 %v1776_v44  ;;  %1699 = vmatpush3.bf16.msra.mxu1 %v1776_v44 }
 0x2b4   : > { %1615 = vmatprep.subr.bf16.mxu0 %v1777_v45  ;;  %1692 = vmatprep.subr.bf16.mxu1 %v1777_v45 }
 0x2b7   : > { %1616 = vmatpush3.bf16.msra.mxu0 %v1777_v45  ;;  %1700 = vmatpush3.bf16.msra.mxu1 %v1777_v45 }
 0x2ba   : > { %1618 = vmatmul.mubr.bf16.vlgmr.msra.gmra.mrb[0].mxu0 %v998_v54  ;;  %1626 = vmatmul.mubr.bf16.vlgmr.msra.gmra.mrb[0].mxu1 %v1002_v55 }
 0x2bb   : > { %1621 = vmatprep.mubr.bf16.mxu0 %v999_v56  ;;  %1629 = vmatprep.mubr.bf16.mxu1 %v1003_v57 }
 0x2c2   : > { %1622 = vmatmul.mubr.bf16.gmra.mrb[4].mxu0 %v1000_v5  ;;  %1630 = vmatmul.mubr.bf16.gmra.mrb[4].mxu1 %v1004_v6 }
 0x38d   : > { %v1619_v14 = vpop.f32.mrb[0].mxu0  ;;  %v1627_v62 = vpop.f32.mrb[0].mxu1 }
 0x38e   : > { %v1123_v7 = vadd.f32 %v1619_v14, %v1444_v13  ;;  %v1155_v8 = vadd.f32 %v1627_v62, %v1444_v13  ;;  %v1114_v63 = vpop.f32.mrb[1].mxu0  ;;  %v1146_v15 = vpop.f32.mrb[1].mxu1 }
 0x38f   : > { %v1115_v16 = vadd.f32 %v1444_v13, %v1114_v63  ;;  %v1147_v0 = vadd.f32 %v1444_v13, %v1146_v15  ;;  %v1620_v1 = vpop.f32.mrb[2].mxu0  ;;  %v1628_v4 = vpop.f32.mrb[2].mxu1 }
 0x390   : > { %v1179_v19 = vmax.f32 %v1123_v7, 0.0  ;;  %v1187_v20 = vmax.f32 %v1155_v8, 0.0  ;;  %v1126_v9 = vadd.f32 %v1620_v1, %v1444_v13  ;;  %v1158_v10 = vadd.f32 %v1628_v4, %v1444_v13  ;;  %v1117_v21 = vpop.f32.mrb[3].mxu0  ;;  %v1149_v17 = vpop.f32.mrb[3].mxu1 }
 0x391   : > { %v1177_v18 = vmax.f32 %v1115_v16, 0.0  ;;  %v1185_v22 = vmax.f32 %v1147_v0, 0.0  ;;  %v1118_v23 = vadd.f32 %v1444_v13, %v1117_v21  ;;  %v1150_v24 = vadd.f32 %v1444_v13, %v1149_v17 }
 0x392   : > { %1198 = vst [vmem:[%s2198_s11 + $0x10] sm:$0xff] %v1179_v19  ;;  %1206 = vst [vmem:[%s2198_s11 + $0x50] sm:$0xff] %v1187_v20  ;;  %v1180_v25 = vmax.f32 %v1126_v9, 0.0  ;;  %v1188_v26 = vmax.f32 %v1158_v10, 0.0 }
 0x393   : > { %1196 = vst [vmem:[%s2198_s11] sm:$0xff] %v1177_v18  ;;  %1204 = vst [vmem:[%s2198_s11 + $0x40] sm:$0xff] %v1185_v22  ;;  %v1178_v27 = vmax.f32 %v1118_v23, 0.0  ;;  %v1186_v28 = vmax.f32 %v1150_v24, 0.0 }
 0x394   : > { %1199 = vst [vmem:[%s2198_s11 + $0x18] sm:$0xff] %v1180_v25  ;;  %1207 = vst [vmem:[%s2198_s11 + $0x58] sm:$0xff] %v1188_v26 }
 0x395   : > { %1197 = vst [vmem:[%s2198_s11 + $0x8] sm:$0xff] %v1178_v27  ;;  %1205 = vst [vmem:[%s2198_s11 + $0x48] sm:$0xff] %v1186_v28  ;;  %v1623_v29 = vpop.f32.mrb[4].mxu0  ;;  %v1631_v30 = vpop.f32.mrb[4].mxu1 }
 0x396   : > { %v1139_v31 = vadd.f32 %v1623_v29, %v1444_v13  ;;  %v1171_v32 = vadd.f32 %v1631_v30, %v1444_v13  ;;  %v1130_v33 = vpop.f32.mrb[5].mxu0  ;;  %v1162_v34 = vpop.f32.mrb[5].mxu1 }
 0x397   : > { %v1131_v35 = vadd.f32 %v1444_v13, %v1130_v33  ;;  %v1163_v36 = vadd.f32 %v1444_v13, %v1162_v34  ;;  %v1624_v2 = vpop.f32.mrb[6].mxu0  ;;  %v1632_v3 = vpop.f32.mrb[6].mxu1 }
 0x398   : > { %v1183_v11 = vmax.f32 %v1139_v31, 0.0  ;;  %v1191_v12 = vmax.f32 %v1171_v32, 0.0  ;;  %v1142_v37 = vadd.f32 %v1624_v2, %v1444_v13  ;;  %v1174_v38 = vadd.f32 %v1632_v3, %v1444_v13  ;;  %v1133_v39 = vpop.f32.mrb[7].mxu0  ;;  %v1165_v40 = vpop.f32.mrb[7].mxu1 }
 0x399   : > { %v1181_v41 = vmax.f32 %v1131_v35, 0.0  ;;  %v1189_v42 = vmax.f32 %v1163_v36, 0.0  ;;  %v1134_v43 = vadd.f32 %v1444_v13, %v1133_v39  ;;  %v1166_v44 = vadd.f32 %v1444_v13, %v1165_v40 }
 0x39a   : > { %1202 = vst [vmem:[%s2198_s11 + $0x30] sm:$0xff] %v1183_v11  ;;  %1210 = vst [vmem:[%s2198_s11 + $0x70] sm:$0xff] %v1191_v12  ;;  %v1184_v45 = vmax.f32 %v1142_v37, 0.0  ;;  %v1192_v46 = vmax.f32 %v1174_v38, 0.0 }
 0x39b   : > { %1200 = vst [vmem:[%s2198_s11 + $0x20] sm:$0xff] %v1181_v41  ;;  %1208 = vst [vmem:[%s2198_s11 + $0x60] sm:$0xff] %v1189_v42  ;;  %v1182_v47 = vmax.f32 %v1134_v43, 0.0  ;;  %v1190_v48 = vmax.f32 %v1166_v44, 0.0 }
 0x39c   : > { %1203 = vst [vmem:[%s2198_s11 + $0x38] sm:$0xff] %v1184_v45  ;;  %1211 = vst [vmem:[%s2198_s11 + $0x78] sm:$0xff] %v1192_v46 }
 0x39d   : > { %1201 = vst [vmem:[%s2198_s11 + $0x28] sm:$0xff] %v1182_v47  ;;  %1209 = vst [vmem:[%s2198_s11 + $0x68] sm:$0xff] %v1190_v48 }
 0x39e PF: > { %p1212_p6 = scmp.eq.s32.totalorder %s1884_s29, 1  ;;  %p1454_p0 = scmp.ne.s32.totalorder %s1884_s29, 1 }
 0x39f   : > { %v1901_v52 = vmov (!%p1454_p0), 0.0   ;;  %vm1902_vm0 = vmmov (!%p1454_p0), 0   ;;  %v1247_v4 = vld [vmem:[%s2243_s5] sm:$0xf] (!%p1454_p0) }
 0x3a0   : > { %1215 = sbr.rel (%p1454_p0) target bundleno = 1181 (0x49d), region = 96  ;;  %1633 = vmatprep.subr.bf16.mxu0 (!%p1454_p0), %v1901_v52  ;;  %1649 = vmatprep.mubr.msk.bf16.mxu0 (!%p1454_p0), %vm1902_vm0, %v1901_v52  ;;  %v1242_v19 = vld [vmem:[#allocation4] sm:$0xff] (!%p1454_p0) }
 0x3a4   : > { %v1455_v49 = vld [vmem:[#allocation3 + $0x80] sm:$0xff] (!%p1454_p0)  ;;  %v1456_v50 = vld [vmem:[#allocation3 + $0x88] sm:$0xff] (!%p1454_p0)  ;;  %v1457_v51 = vld [vmem:[#allocation3 + $0x90] sm:$0xff] (!%p1454_p0) }
 0x3a5   : > { %v1234_v53 = vpack.c.bf16 (!%p1454_p0), %v1456_v50, %v1455_v49  ;;  %v1458_v54 = vld [vmem:[#allocation3 + $0x98] sm:$0xff] (!%p1454_p0)  ;;  %v1459_v56 = vld [vmem:[#allocation3 + $0xa0] sm:$0xff] (!%p1454_p0)  ;;  %v1460_v57 = vld [vmem:[#allocation3 + $0xa8] sm:$0xff] (!%p1454_p0) }
 0x3a6   : > { %v1235_v55 = vpack.c.bf16 (!%p1454_p0), %v1458_v54, %v1457_v51  ;;  %v1236_v58 = vpack.c.bf16 (!%p1454_p0), %v1460_v57, %v1459_v56  ;;  %v1461_v59 = vld [vmem:[#allocation3 + $0xb0] sm:$0xff] (!%p1454_p0)  ;;  %v1462_v60 = vld [vmem:[#allocation3 + $0xb8] sm:$0xff] (!%p1454_p0)  ;;  %v1463_v5 = vld [vmem:[#allocation3 + $0xc0] sm:$0xff] (!%p1454_p0) }
 0x3a7   : > { %1634 = vmatpush3.bf16.msra.mxu0 %v1234_v53  ;;  %v1237_v61 = vpack.c.bf16 %v1462_v60, %v1461_v59  ;;  %v1464_v6 = vld [vmem:[#allocation3 + $0xc8] sm:$0xff]  ;;  %v1465_v14 = vld [vmem:[#allocation3 + $0xd0] sm:$0xff]  ;;  %v1466_v62 = vld [vmem:[#allocation3 + $0xd8] sm:$0xff] }
 0x3a8   : > { %1635 = vmatprep.subr.bf16.mxu0 %v1901_v52  ;;  %v1238_v13 = vpack.c.bf16 %v1464_v6, %v1463_v5  ;;  %v1239_v7 = vpack.c.bf16 %v1466_v62, %v1465_v14  ;;  %v1467_v8 = vld [vmem:[#allocation3 + $0xe0] sm:$0xff]  ;;  %v1468_v63 = vld [vmem:[#allocation3 + $0xe8] sm:$0xff]  ;;  %v1469_v16 = vld [vmem:[#allocation3 + $0xf0] sm:$0xff] }
 0x3a9   : > { %v1240_v15 = vpack.c.bf16 %v1468_v63, %v1467_v8  ;;  %v1470_v0 = vld [vmem:[#allocation3 + $0xf8] sm:$0xff] }
 0x3aa   : > { %v1241_v1 = vpack.c.bf16 %v1470_v0, %v1469_v16 }
 0x3ab   : > { %1636 = vmatpush3.bf16.msra.mxu0 %v1235_v55 }
 0x3ac   : > { %1637 = vmatprep.subr.bf16.mxu0 %v1901_v52 }
 0x3af   : > { %1638 = vmatpush3.bf16.msra.mxu0 %v1236_v58 }
 0x3b0   : > { %1639 = vmatprep.subr.bf16.mxu0 %v1901_v52 }
 0x3b3   : > { %1640 = vmatpush3.bf16.msra.mxu0 %v1237_v61 }
 0x3b4   : > { %1641 = vmatprep.subr.bf16.mxu0 %v1901_v52 }
 0x3b7   : > { %1642 = vmatpush3.bf16.msra.mxu0 %v1238_v13 }
 0x3b8   : > { %1643 = vmatprep.subr.bf16.mxu0 %v1901_v52 }
 0x3bb   : > { %1644 = vmatpush3.bf16.msra.mxu0 %v1239_v7 }
 0x3bc   : > { %1645 = vmatprep.subr.bf16.mxu0 %v1901_v52 }
 0x3bf   : > { %1646 = vmatpush3.bf16.msra.mxu0 %v1240_v15 }
 0x3c0   : > { %1647 = vmatprep.subr.bf16.mxu0 %v1901_v52 }
 0x3c3   : > { %1648 = vmatpush3.bf16.msra.mxu0 %v1241_v1 }
 0x3c6   : > { %1650 = vmatmul.mubr.bf16.vlgmr.msra.gmra.mrb[0].mxu0 %v1247_v4 }
 0x499   : > { %v1282_v20 = vpop.f32.mrb[0].mxu0 }
 0x49a   : > { %v1288_v9 = vadd.f32 %v1282_v20, %v1242_v19  ;;  %v1651_v10 = vpop.f32.mrb[1].mxu0 }
 0x49b   : > { %v1285_v21 = vpop.f32.mrb[2].mxu0 }
 0x49c   : > { %1289 = vst [vmem:[#allocation4] sm:$0xff] %v1288_v9  ;;  %v1652_v17 = vpop.f32.mrb[3].mxu0 }
 0x49d PF: > { %1293 = sbr.rel (!%p1212_p6) target bundleno = 1335 (0x537), region = 100  ;;  %v1472_v22 = vld [vmem:[%s2244_s6] ss:$0 sm:$0xff] (%p1212_p6)  ;;  %v1473_v24 = vld [vmem:[#allocation5] ss:$0 sm:$0xff] (%p1212_p6)  ;;  %vm1313_vm1 = vcmask (%p1212_p6), 7168  }
 0x4a3   : > { %v1294_v18 = vld [vmem:[#allocation4] sm:$0xff] (%p1212_p6) }
 0x4a4   : > { %v1302_v23 = vmul.f32 %v1472_v22, %v1294_v18 }
 0x4a6   : > { %1303 = vadd.xlane.f32.xlu0 %v1302_v23 }
 0x533   : > { %v1304_v25 = vpop.xlane.xlu0 %1303 }
 0x534   : > { %v1312_v26 = vadd.f32 %v1473_v24, %v1304_v25 }
 0x536   : > { %1314 = vst.msk [vmem:[%s2246_s8] sm:$0xff] %vm1313_vm1, %v1312_v26 }
 0x537 PF: > { %s22_s9 = sadd.s32 1, %s1892_s9   ;;  %s2257_s29 = smov %s1888_s30 }
 0x538   : > { %p19_p1 = scmp.ge.s32.totalorder %s22_s9, 4   ;;  %s2258_s30 = smov %s2260_s15 }
 0x53a   :  { %21 = sbr.rel (!%p19_p1) target bundleno = 6 (0x6), region = 133 }
 0x541   :  { %1326 = vsyncpa [#allocation7], 1 }
 0x542   :  { %1328 = vsyncpa [#allocation7 + $0x1], 1 }
 0x543   :  { %1329 = vsyncpa [#allocation9], 1 }

</bundles_post_ra>
